<compile_context>
chip_gen: v7x
topology: tpu7x:2x2x1
jax: 0.10.0
libtpu: 0.0.40
codegen_flags: <defaults>
</compile_context>

<pallas_src>
import functools
import math

import jax
import jax.numpy as jnp
from jax.experimental import pallas as pl
from jax.experimental.pallas import tpu as pltpu


def _bert_cnn_kernel(
    wemb_ref, pos_ref, type_ref,
    ln0_g_ref, ln0_b_ref,
    wqkv_ref, bqkv_ref,
    wo_ref, bo_ref,
    ln1_g_ref, ln1_b_ref,
    w1_ref, b1_ref, w2_ref, b2_ref,
    ln2_g_ref, ln2_b_ref,
    convw_ref,
    out_ref,
    *, n_heads, kernel_size,
):
    f32 = jnp.float32
    bf16 = jnp.bfloat16
    seq, hidden = out_ref.shape
    dh = hidden // n_heads

    def layernorm(v, g, b):
        v = v.astype(f32)
        mu = jnp.mean(v, axis=-1, keepdims=True)
        var = jnp.mean(jnp.square(v - mu), axis=-1, keepdims=True)
        return (v - mu) * jax.lax.rsqrt(var + 1e-12) * g + b

    # --- embeddings (word + position + token-type 0) + embedding LayerNorm ---
    x = wemb_ref[...] + pos_ref[...] + type_ref[...]            # (S, H) f32
    x = layernorm(x, ln0_g_ref[...], ln0_b_ref[...])

    # --- self-attention: fused QKV projection, per-head attention in VMEM ---
    qkv = jnp.dot(x.astype(bf16), wqkv_ref[...],
                  preferred_element_type=f32) + bqkv_ref[...]   # (S, 3H) f32
    scale = 1.0 / math.sqrt(dh)
    attn = jnp.zeros((seq, hidden), f32)
    for h in range(n_heads):                                    # static unroll
        q_h = qkv[:, h * dh:(h + 1) * dh]
        k_h = qkv[:, hidden + h * dh: hidden + (h + 1) * dh]
        v_h = qkv[:, 2 * hidden + h * dh: 2 * hidden + (h + 1) * dh]
        s = jnp.einsum("qd,kd->qk", q_h, k_h,
                       preferred_element_type=f32) * scale      # (S, S)
        s = s - jnp.max(s, axis=-1, keepdims=True)
        p = jnp.exp(s)
        p = p * pl.reciprocal(jnp.sum(p, axis=-1, keepdims=True), approx=True)
        ctx = jnp.dot(p, v_h, preferred_element_type=f32)       # (S, dh)
        # merge-heads + output projection fused:
        #   concat_h(ctx_h) @ Wo == sum_h ctx_h @ Wo[h*dh:(h+1)*dh, :]
        attn = attn + jnp.dot(ctx, wo_ref[h * dh:(h + 1) * dh, :],
                              preferred_element_type=f32)
    attn = attn + bo_ref[...]

    # --- residual + LayerNorm (fused) ---
    x = layernorm(x + attn, ln1_g_ref[...], ln1_b_ref[...])

    # --- feed-forward (GELU, tanh approximation), f32 elementwise math ---
    h1 = jnp.dot(x.astype(bf16), w1_ref[...],
                 preferred_element_type=f32) + b1_ref[...]
    c = jnp.float32(math.sqrt(2.0 / math.pi))
    h1 = 0.5 * h1 * (1.0 + jnp.tanh(c * (h1 + 0.044715 * h1 * h1 * h1)))
    ffn = jnp.dot(h1.astype(bf16), w2_ref[...],
                  preferred_element_type=f32) + b2_ref[...]

    # --- residual + LayerNorm (fused); == bert(x)[0] for this batch row ---
    x = layernorm(x + ffn, ln2_g_ref[...], ln2_b_ref[...])

    # --- CNN head: Conv1d(H, H, K, bias=False, padding=(K-1)//2) over seq ---
    # Per-tap matmuls; the shifted-sequence (zero at the edges) is produced by
    # a 0/1 shift matrix built from iota, so no in-kernel padding or unaligned
    # sublane slicing is needed. out[s] = sum_k x[s + k - pad] @ W_tap[k].
    pad = (kernel_size - 1) // 2
    row = jax.lax.broadcasted_iota(jnp.int32, (seq, seq), 0)
    col = jax.lax.broadcasted_iota(jnp.int32, (seq, seq), 1)
    acc = jnp.zeros((seq, hidden), f32)
    for k in range(kernel_size):                                # static unroll
        d = k - pad
        shift = (col == row + d).astype(f32)                    # (S, S) 0/1
        xs = jnp.dot(shift, x, preferred_element_type=f32)      # rows x[s+d]
        acc = acc + jnp.dot(xs.astype(bf16), convw_ref[k],
                            preferred_element_type=f32)
    out_ref[...] = acc.astype(out_ref.dtype)


# ---------------------------------------------------------------------------
# Parameter init (deterministic, synthetic — no checkpoint load)
# ---------------------------------------------------------------------------
def init_params(key, *, vocab=30, max_pos=16, hidden=32, n_heads=4,
                intermediate=64, kernel_size=3):
    assert hidden % n_heads == 0
    assert kernel_size % 2 == 1, "'same' padding assumes an odd kernel size"
    ks = jax.random.split(key, 10)
    std = 0.02

    def nrm(k, shape):
        return (std * jax.random.normal(k, shape)).astype(jnp.float32)

    wq = nrm(ks[3], (hidden, hidden))
    wk = nrm(ks[4], (hidden, hidden))
    wv = nrm(ks[5], (hidden, hidden))
    conv_torch = nrm(ks[9], (hidden, hidden, kernel_size))      # [out, in, K]

    p = {
        "word_emb": nrm(ks[0], (vocab, hidden)),
        "pos_emb": nrm(ks[1], (max_pos, hidden)),
        "type_emb": nrm(ks[2], (2, hidden)),
        "ln0_g": jnp.ones((1, hidden), jnp.float32),
        "ln0_b": jnp.zeros((1, hidden), jnp.float32),
        # fused QKV projection: one [H, 3H] bf16 matmul instead of three [H, H]
        "wqkv": jnp.concatenate([wq, wk, wv], axis=1).astype(jnp.bfloat16),
        "bqkv": jnp.zeros((1, 3 * hidden), jnp.float32),
        "wo": nrm(ks[6], (hidden, hidden)),                     # f32 (tiny; 8-row slices stay sublane-aligned)
        "bo": jnp.zeros((1, hidden), jnp.float32),
        "ln1_g": jnp.ones((1, hidden), jnp.float32),
        "ln1_b": jnp.zeros((1, hidden), jnp.float32),
        "w1": nrm(ks[7], (hidden, intermediate)).astype(jnp.bfloat16),
        "b1": jnp.zeros((1, intermediate), jnp.float32),
        "w2": nrm(ks[8], (intermediate, hidden)).astype(jnp.bfloat16),
        "b2": jnp.zeros((1, hidden), jnp.float32),
        "ln2_g": jnp.ones((1, hidden), jnp.float32),
        "ln2_b": jnp.zeros((1, hidden), jnp.float32),
        # Conv1d weight, PyTorch layout [out_ch, in_ch, K] -> tap-major [K, in, out]
        "conv_w": jnp.transpose(conv_torch, (2, 1, 0)).astype(jnp.bfloat16),
    }
    return p


# ---------------------------------------------------------------------------
# Forward pass: BertCNN.forward(x) == cnn(bert(x)[0]) — one fused pallas_call
# ---------------------------------------------------------------------------
@functools.partial(jax.jit, static_argnames=("n_heads", "kernel_size"))
def bert_cnn_forward(token_ids, p, *, n_heads, kernel_size):
    batch, seq = token_ids.shape
    hidden = p["word_emb"].shape[1]

    # TODO(synk): embedding-table gather stays in plain JAX (no natural Pallas
    # tiling at this size); everything downstream runs in the fused kernel.
    wemb = jnp.take(p["word_emb"], token_ids, axis=0)           # (B, S, H)
    pos = p["pos_emb"][:seq]                                    # (S, H)
    type0 = p["type_emb"][0:1]                                  # (1, H) -- token_type_ids == 0

    weights = [
        pos, type0,
        p["ln0_g"], p["ln0_b"],
        p["wqkv"], p["bqkv"],
        p["wo"], p["bo"],
        p["ln1_g"], p["ln1_b"],
        p["w1"], p["b1"], p["w2"], p["b2"],
        p["ln2_g"], p["ln2_b"],
        p["conv_w"],
    ]

    def _replicated(ndim):
        return lambda b: (0,) * ndim

    in_specs = [pl.BlockSpec((None, seq, hidden), lambda b: (b, 0, 0))]
    in_specs += [pl.BlockSpec(w.shape, _replicated(w.ndim)) for w in weights]

    kernel = functools.partial(_bert_cnn_kernel, n_heads=n_heads,
                               kernel_size=kernel_size)

    return pl.pallas_call(
        kernel,
        out_shape=jax.ShapeDtypeStruct((batch, seq, hidden), jnp.float32),
        grid=(batch,),
        in_specs=in_specs,
        out_specs=pl.BlockSpec((None, seq, hidden), lambda b: (b, 0, 0)),
        compiler_params=pltpu.CompilerParams(
            dimension_semantics=("parallel",)),                 # 2 TCs on v7x
    )(wemb, *weights)


if __name__ == "__main__":
    key = jax.random.PRNGKey(0)
    k_param, k_ids = jax.random.split(key)

    BATCH, SEQ, HIDDEN, VOCAB = 2, 8, 32, 30
    N_HEADS, INTERMEDIATE, KSIZE = 4, 64, 3

    params = init_params(k_param, vocab=VOCAB, max_pos=16, hidden=HIDDEN,
                         n_heads=N_HEADS, intermediate=INTERMEDIATE,
                         kernel_size=KSIZE)
    token_ids = jax.random.randint(k_ids, (BATCH, SEQ), 0, VOCAB, dtype=jnp.int32)

    out = bert_cnn_forward(token_ids, params, n_heads=N_HEADS, kernel_size=KSIZE)
    out = jax.block_until_ready(out)
    assert out.shape == (BATCH, SEQ, HIDDEN) and out.dtype == jnp.float32
    assert bool(jnp.all(jnp.isfinite(out)))
    print("KERNEL_OK")
</pallas_src>

<mosaic_0001>
module attributes {stable_mosaic.version = 11 : i64} {
  func.func @_bert_cnn_kernel(%arg0: i32, %arg1: memref<1x8x32xf32, #tpu.memory_space<vmem>>, %arg2: memref<8x32xf32, #tpu.memory_space<vmem>>, %arg3: memref<1x32xf32, #tpu.memory_space<vmem>>, %arg4: memref<1x32xf32, #tpu.memory_space<vmem>>, %arg5: memref<1x32xf32, #tpu.memory_space<vmem>>, %arg6: memref<32x96xbf16, #tpu.memory_space<vmem>>, %arg7: memref<1x96xf32, #tpu.memory_space<vmem>>, %arg8: memref<32x32xf32, #tpu.memory_space<vmem>>, %arg9: memref<1x32xf32, #tpu.memory_space<vmem>>, %arg10: memref<1x32xf32, #tpu.memory_space<vmem>>, %arg11: memref<1x32xf32, #tpu.memory_space<vmem>>, %arg12: memref<32x64xbf16, #tpu.memory_space<vmem>>, %arg13: memref<1x64xf32, #tpu.memory_space<vmem>>, %arg14: memref<64x32xbf16, #tpu.memory_space<vmem>>, %arg15: memref<1x32xf32, #tpu.memory_space<vmem>>, %arg16: memref<1x32xf32, #tpu.memory_space<vmem>>, %arg17: memref<1x32xf32, #tpu.memory_space<vmem>>, %arg18: memref<3x32x32xbf16, #tpu.memory_space<vmem>>, %arg19: memref<1x8x32xf32, #tpu.memory_space<vmem>>) attributes {dimension_semantics = [#tpu.dimension_semantics<parallel>], iteration_bounds = array<i64: 2>, scalar_prefetch = 0 : i64, scratch_operands = 0 : i64, tpu.core_type = #tpu.core_type<tc>, window_params = [{transform_indices = @transform_0, window_bounds = array<i64: 1, 8, 32>}, {pipeline_mode = #tpu.pipeline_mode<synchronous>, transform_indices = @transform_1, window_bounds = array<i64: 8, 32>}, {pipeline_mode = #tpu.pipeline_mode<synchronous>, transform_indices = @transform_2, window_bounds = array<i64: 1, 32>}, {pipeline_mode = #tpu.pipeline_mode<synchronous>, transform_indices = @transform_3, window_bounds = array<i64: 1, 32>}, {pipeline_mode = #tpu.pipeline_mode<synchronous>, transform_indices = @transform_4, window_bounds = array<i64: 1, 32>}, {pipeline_mode = #tpu.pipeline_mode<synchronous>, transform_indices = @transform_5, window_bounds = array<i64: 32, 96>}, {pipeline_mode = #tpu.pipeline_mode<synchronous>, transform_indices = @transform_6, window_bounds = array<i64: 1, 96>}, {pipeline_mode = #tpu.pipeline_mode<synchronous>, transform_indices = @transform_7, window_bounds = array<i64: 32, 32>}, {pipeline_mode = #tpu.pipeline_mode<synchronous>, transform_indices = @transform_8, window_bounds = array<i64: 1, 32>}, {pipeline_mode = #tpu.pipeline_mode<synchronous>, transform_indices = @transform_9, window_bounds = array<i64: 1, 32>}, {pipeline_mode = #tpu.pipeline_mode<synchronous>, transform_indices = @transform_10, window_bounds = array<i64: 1, 32>}, {pipeline_mode = #tpu.pipeline_mode<synchronous>, transform_indices = @transform_11, window_bounds = array<i64: 32, 64>}, {pipeline_mode = #tpu.pipeline_mode<synchronous>, transform_indices = @transform_12, window_bounds = array<i64: 1, 64>}, {pipeline_mode = #tpu.pipeline_mode<synchronous>, transform_indices = @transform_13, window_bounds = array<i64: 64, 32>}, {pipeline_mode = #tpu.pipeline_mode<synchronous>, transform_indices = @transform_14, window_bounds = array<i64: 1, 32>}, {pipeline_mode = #tpu.pipeline_mode<synchronous>, transform_indices = @transform_15, window_bounds = array<i64: 1, 32>}, {pipeline_mode = #tpu.pipeline_mode<synchronous>, transform_indices = @transform_16, window_bounds = array<i64: 1, 32>}, {pipeline_mode = #tpu.pipeline_mode<synchronous>, transform_indices = @transform_17, window_bounds = array<i64: 3, 32, 32>}, {transform_indices = @transform_18, window_bounds = array<i64: 1, 8, 32>}]} {
    %c0 = arith.constant 0 : index
    %c0_0 = arith.constant 0 : index
    %c0_1 = arith.constant 0 : index
    %0 = vector.load %arg1[%c0, %c0_0, %c0_1] : memref<1x8x32xf32, #tpu.memory_space<vmem>>, vector<1x8x32xf32>
    %1 = vector.shape_cast %0 : vector<1x8x32xf32> to vector<8x32xf32>
    %c0_2 = arith.constant 0 : index
    %c0_3 = arith.constant 0 : index
    %2 = vector.load %arg2[%c0_2, %c0_3] : memref<8x32xf32, #tpu.memory_space<vmem>>, vector<8x32xf32>
    %3 = arith.addf %1, %2 : vector<8x32xf32>
    %c0_4 = arith.constant 0 : index
    %c0_5 = arith.constant 0 : index
    %4 = vector.load %arg3[%c0_4, %c0_5] : memref<1x32xf32, #tpu.memory_space<vmem>>, vector<1x32xf32>
    %5 = vector.broadcast %4 : vector<1x32xf32> to vector<8x32xf32>
    %6 = arith.addf %3, %5 : vector<8x32xf32>
    %c0_6 = arith.constant 0 : index
    %c0_7 = arith.constant 0 : index
    %7 = vector.load %arg4[%c0_6, %c0_7] : memref<1x32xf32, #tpu.memory_space<vmem>>, vector<1x32xf32>
    %c0_8 = arith.constant 0 : index
    %c0_9 = arith.constant 0 : index
    %8 = vector.load %arg5[%c0_8, %c0_9] : memref<1x32xf32, #tpu.memory_space<vmem>>, vector<1x32xf32>
    %cst = arith.constant dense<0.000000e+00> : vector<8xf32>
    %9 = vector.multi_reduction <add>, %6, %cst [1] : vector<8x32xf32> to vector<8xf32>
    %10 = vector.shape_cast %9 : vector<8xf32> to vector<8x1xf32>
    %cst_10 = arith.constant 3.200000e+01 : f32
    %11 = vector.broadcast %cst_10 : f32 to vector<8x1xf32>
    %12 = arith.divf %10, %11 : vector<8x1xf32>
    %13 = vector.broadcast %12 : vector<8x1xf32> to vector<8x32xf32>
    %14 = arith.subf %6, %13 : vector<8x32xf32>
    %15 = arith.mulf %14, %14 : vector<8x32xf32>
    %cst_11 = arith.constant dense<0.000000e+00> : vector<8xf32>
    %16 = vector.multi_reduction <add>, %15, %cst_11 [1] : vector<8x32xf32> to vector<8xf32>
    %17 = vector.shape_cast %16 : vector<8xf32> to vector<8x1xf32>
    %cst_12 = arith.constant 3.200000e+01 : f32
    %18 = vector.broadcast %cst_12 : f32 to vector<8x1xf32>
    %19 = arith.divf %17, %18 : vector<8x1xf32>
    %20 = vector.broadcast %12 : vector<8x1xf32> to vector<8x32xf32>
    %21 = arith.subf %6, %20 : vector<8x32xf32>
    %cst_13 = arith.constant 9.99999996E-13 : f32
    %22 = vector.broadcast %cst_13 : f32 to vector<8x1xf32>
    %23 = arith.addf %19, %22 : vector<8x1xf32>
    %24 = math.rsqrt %23 : vector<8x1xf32>
    %25 = vector.broadcast %24 : vector<8x1xf32> to vector<8x32xf32>
    %26 = arith.mulf %21, %25 : vector<8x32xf32>
    %27 = vector.broadcast %7 : vector<1x32xf32> to vector<8x32xf32>
    %28 = arith.mulf %26, %27 : vector<8x32xf32>
    %29 = vector.broadcast %8 : vector<1x32xf32> to vector<8x32xf32>
    %30 = arith.addf %28, %29 : vector<8x32xf32>
    %31 = arith.truncf %30 : vector<8x32xf32> to vector<8x32xbf16>
    %c0_14 = arith.constant 0 : index
    %c0_15 = arith.constant 0 : index
    %32 = vector.load %arg6[%c0_14, %c0_15] : memref<32x96xbf16, #tpu.memory_space<vmem>>, vector<32x96xbf16>
    %cst_16 = arith.constant dense<0.000000e+00> : vector<8x96xf32>
    %33 = tpu.matmul %31, %32, %cst_16 {dimension_numbers = #tpu.dot_dimension_numbers<[1], [0], [0], [1], [0, 0, 1, 1], [], []>} : vector<8x32xbf16>, vector<32x96xbf16>, vector<8x96xf32> -> vector<8x96xf32>
    %c0_17 = arith.constant 0 : index
    %c0_18 = arith.constant 0 : index
    %34 = vector.load %arg7[%c0_17, %c0_18] : memref<1x96xf32, #tpu.memory_space<vmem>>, vector<1x96xf32>
    %35 = vector.broadcast %34 : vector<1x96xf32> to vector<8x96xf32>
    %36 = arith.addf %33, %35 : vector<8x96xf32>
    %cst_19 = arith.constant 0.000000e+00 : f32
    %37 = vector.broadcast %cst_19 : f32 to vector<8x32xf32>
    %38 = vector.extract_strided_slice %36 {offsets = [0, 0], sizes = [8, 8], strides = [1, 1]} : vector<8x96xf32> to vector<8x8xf32>
    %39 = vector.extract_strided_slice %36 {offsets = [0, 32], sizes = [8, 8], strides = [1, 1]} : vector<8x96xf32> to vector<8x8xf32>
    %40 = vector.extract_strided_slice %36 {offsets = [0, 64], sizes = [8, 8], strides = [1, 1]} : vector<8x96xf32> to vector<8x8xf32>
    "tpu.trace_start"() <{level = 10 : i32, message = "qd,kd->qk"}> : () -> ()
    %cst_20 = arith.constant dense<0.000000e+00> : vector<8x8xf32>
    %41 = tpu.matmul %38, %39, %cst_20 {dimension_numbers = #tpu.dot_dimension_numbers<[1], [1], [0], [0], [0, 0, 1, 0], [], []>} : vector<8x8xf32>, vector<8x8xf32>, vector<8x8xf32> -> vector<8x8xf32>
    "tpu.trace_stop"() : () -> ()
    %cst_21 = arith.constant 0.353553385 : f32
    %42 = vector.broadcast %cst_21 : f32 to vector<8x8xf32>
    %43 = arith.mulf %41, %42 : vector<8x8xf32>
    %cst_22 = arith.constant dense<0xFF800000> : vector<8xf32>
    %44 = vector.multi_reduction <maximumf>, %43, %cst_22 [1] : vector<8x8xf32> to vector<8xf32>
    %45 = vector.shape_cast %44 : vector<8xf32> to vector<8x1xf32>
    %46 = vector.broadcast %45 : vector<8x1xf32> to vector<8x8xf32>
    %47 = arith.subf %43, %46 : vector<8x8xf32>
    %48 = math.exp %47 : vector<8x8xf32>
    %cst_23 = arith.constant dense<0.000000e+00> : vector<8xf32>
    %49 = vector.multi_reduction <add>, %48, %cst_23 [1] : vector<8x8xf32> to vector<8xf32>
    %50 = vector.shape_cast %49 : vector<8xf32> to vector<8x1xf32>
    %51 = tpu.reciprocal %50 {approx = true} : vector<8x1xf32> -> vector<8x1xf32>
    %52 = vector.broadcast %51 : vector<8x1xf32> to vector<8x8xf32>
    %53 = arith.mulf %48, %52 : vector<8x8xf32>
    %cst_24 = arith.constant dense<0.000000e+00> : vector<8x8xf32>
    %54 = tpu.matmul %53, %40, %cst_24 {dimension_numbers = #tpu.dot_dimension_numbers<[1], [0], [0], [1], [0, 0, 1, 1], [], []>} : vector<8x8xf32>, vector<8x8xf32>, vector<8x8xf32> -> vector<8x8xf32>
    %c0_25 = arith.constant 0 : index
    %c0_26 = arith.constant 0 : index
    %55 = vector.load %arg8[%c0_25, %c0_26] : memref<32x32xf32, #tpu.memory_space<vmem>>, vector<8x32xf32>
    %cst_27 = arith.constant dense<0.000000e+00> : vector<8x32xf32>
    %56 = tpu.matmul %54, %55, %cst_27 {dimension_numbers = #tpu.dot_dimension_numbers<[1], [0], [0], [1], [0, 0, 1, 1], [], []>} : vector<8x8xf32>, vector<8x32xf32>, vector<8x32xf32> -> vector<8x32xf32>
    %57 = arith.addf %37, %56 : vector<8x32xf32>
    %58 = vector.extract_strided_slice %36 {offsets = [0, 8], sizes = [8, 8], strides = [1, 1]} : vector<8x96xf32> to vector<8x8xf32>
    %59 = vector.extract_strided_slice %36 {offsets = [0, 40], sizes = [8, 8], strides = [1, 1]} : vector<8x96xf32> to vector<8x8xf32>
    %60 = vector.extract_strided_slice %36 {offsets = [0, 72], sizes = [8, 8], strides = [1, 1]} : vector<8x96xf32> to vector<8x8xf32>
    "tpu.trace_start"() <{level = 10 : i32, message = "qd,kd->qk"}> : () -> ()
    %cst_28 = arith.constant dense<0.000000e+00> : vector<8x8xf32>
    %61 = tpu.matmul %58, %59, %cst_28 {dimension_numbers = #tpu.dot_dimension_numbers<[1], [1], [0], [0], [0, 0, 1, 0], [], []>} : vector<8x8xf32>, vector<8x8xf32>, vector<8x8xf32> -> vector<8x8xf32>
    "tpu.trace_stop"() : () -> ()
    %cst_29 = arith.constant 0.353553385 : f32
    %62 = vector.broadcast %cst_29 : f32 to vector<8x8xf32>
    %63 = arith.mulf %61, %62 : vector<8x8xf32>
    %cst_30 = arith.constant dense<0xFF800000> : vector<8xf32>
    %64 = vector.multi_reduction <maximumf>, %63, %cst_30 [1] : vector<8x8xf32> to vector<8xf32>
    %65 = vector.shape_cast %64 : vector<8xf32> to vector<8x1xf32>
    %66 = vector.broadcast %65 : vector<8x1xf32> to vector<8x8xf32>
    %67 = arith.subf %63, %66 : vector<8x8xf32>
    %68 = math.exp %67 : vector<8x8xf32>
    %cst_31 = arith.constant dense<0.000000e+00> : vector<8xf32>
    %69 = vector.multi_reduction <add>, %68, %cst_31 [1] : vector<8x8xf32> to vector<8xf32>
    %70 = vector.shape_cast %69 : vector<8xf32> to vector<8x1xf32>
    %71 = tpu.reciprocal %70 {approx = true} : vector<8x1xf32> -> vector<8x1xf32>
    %72 = vector.broadcast %71 : vector<8x1xf32> to vector<8x8xf32>
    %73 = arith.mulf %68, %72 : vector<8x8xf32>
    %cst_32 = arith.constant dense<0.000000e+00> : vector<8x8xf32>
    %74 = tpu.matmul %73, %60, %cst_32 {dimension_numbers = #tpu.dot_dimension_numbers<[1], [0], [0], [1], [0, 0, 1, 1], [], []>} : vector<8x8xf32>, vector<8x8xf32>, vector<8x8xf32> -> vector<8x8xf32>
    %c8 = arith.constant 8 : index
    %c0_33 = arith.constant 0 : index
    %75 = vector.load %arg8[%c8, %c0_33] : memref<32x32xf32, #tpu.memory_space<vmem>>, vector<8x32xf32>
    %cst_34 = arith.constant dense<0.000000e+00> : vector<8x32xf32>
    %76 = tpu.matmul %74, %75, %cst_34 {dimension_numbers = #tpu.dot_dimension_numbers<[1], [0], [0], [1], [0, 0, 1, 1], [], []>} : vector<8x8xf32>, vector<8x32xf32>, vector<8x32xf32> -> vector<8x32xf32>
    %77 = arith.addf %57, %76 : vector<8x32xf32>
    %78 = vector.extract_strided_slice %36 {offsets = [0, 16], sizes = [8, 8], strides = [1, 1]} : vector<8x96xf32> to vector<8x8xf32>
    %79 = vector.extract_strided_slice %36 {offsets = [0, 48], sizes = [8, 8], strides = [1, 1]} : vector<8x96xf32> to vector<8x8xf32>
    %80 = vector.extract_strided_slice %36 {offsets = [0, 80], sizes = [8, 8], strides = [1, 1]} : vector<8x96xf32> to vector<8x8xf32>
    "tpu.trace_start"() <{level = 10 : i32, message = "qd,kd->qk"}> : () -> ()
    %cst_35 = arith.constant dense<0.000000e+00> : vector<8x8xf32>
    %81 = tpu.matmul %78, %79, %cst_35 {dimension_numbers = #tpu.dot_dimension_numbers<[1], [1], [0], [0], [0, 0, 1, 0], [], []>} : vector<8x8xf32>, vector<8x8xf32>, vector<8x8xf32> -> vector<8x8xf32>
    "tpu.trace_stop"() : () -> ()
    %cst_36 = arith.constant 0.353553385 : f32
    %82 = vector.broadcast %cst_36 : f32 to vector<8x8xf32>
    %83 = arith.mulf %81, %82 : vector<8x8xf32>
    %cst_37 = arith.constant dense<0xFF800000> : vector<8xf32>
    %84 = vector.multi_reduction <maximumf>, %83, %cst_37 [1] : vector<8x8xf32> to vector<8xf32>
    %85 = vector.shape_cast %84 : vector<8xf32> to vector<8x1xf32>
    %86 = vector.broadcast %85 : vector<8x1xf32> to vector<8x8xf32>
    %87 = arith.subf %83, %86 : vector<8x8xf32>
    %88 = math.exp %87 : vector<8x8xf32>
    %cst_38 = arith.constant dense<0.000000e+00> : vector<8xf32>
    %89 = vector.multi_reduction <add>, %88, %cst_38 [1] : vector<8x8xf32> to vector<8xf32>
    %90 = vector.shape_cast %89 : vector<8xf32> to vector<8x1xf32>
    %91 = tpu.reciprocal %90 {approx = true} : vector<8x1xf32> -> vector<8x1xf32>
    %92 = vector.broadcast %91 : vector<8x1xf32> to vector<8x8xf32>
    %93 = arith.mulf %88, %92 : vector<8x8xf32>
    %cst_39 = arith.constant dense<0.000000e+00> : vector<8x8xf32>
    %94 = tpu.matmul %93, %80, %cst_39 {dimension_numbers = #tpu.dot_dimension_numbers<[1], [0], [0], [1], [0, 0, 1, 1], [], []>} : vector<8x8xf32>, vector<8x8xf32>, vector<8x8xf32> -> vector<8x8xf32>
    %c16 = arith.constant 16 : index
    %c0_40 = arith.constant 0 : index
    %95 = vector.load %arg8[%c16, %c0_40] : memref<32x32xf32, #tpu.memory_space<vmem>>, vector<8x32xf32>
    %cst_41 = arith.constant dense<0.000000e+00> : vector<8x32xf32>
    %96 = tpu.matmul %94, %95, %cst_41 {dimension_numbers = #tpu.dot_dimension_numbers<[1], [0], [0], [1], [0, 0, 1, 1], [], []>} : vector<8x8xf32>, vector<8x32xf32>, vector<8x32xf32> -> vector<8x32xf32>
    %97 = arith.addf %77, %96 : vector<8x32xf32>
    %98 = vector.extract_strided_slice %36 {offsets = [0, 24], sizes = [8, 8], strides = [1, 1]} : vector<8x96xf32> to vector<8x8xf32>
    %99 = vector.extract_strided_slice %36 {offsets = [0, 56], sizes = [8, 8], strides = [1, 1]} : vector<8x96xf32> to vector<8x8xf32>
    %100 = vector.extract_strided_slice %36 {offsets = [0, 88], sizes = [8, 8], strides = [1, 1]} : vector<8x96xf32> to vector<8x8xf32>
    "tpu.trace_start"() <{level = 10 : i32, message = "qd,kd->qk"}> : () -> ()
    %cst_42 = arith.constant dense<0.000000e+00> : vector<8x8xf32>
    %101 = tpu.matmul %98, %99, %cst_42 {dimension_numbers = #tpu.dot_dimension_numbers<[1], [1], [0], [0], [0, 0, 1, 0], [], []>} : vector<8x8xf32>, vector<8x8xf32>, vector<8x8xf32> -> vector<8x8xf32>
    "tpu.trace_stop"() : () -> ()
    %cst_43 = arith.constant 0.353553385 : f32
    %102 = vector.broadcast %cst_43 : f32 to vector<8x8xf32>
    %103 = arith.mulf %101, %102 : vector<8x8xf32>
    %cst_44 = arith.constant dense<0xFF800000> : vector<8xf32>
    %104 = vector.multi_reduction <maximumf>, %103, %cst_44 [1] : vector<8x8xf32> to vector<8xf32>
    %105 = vector.shape_cast %104 : vector<8xf32> to vector<8x1xf32>
    %106 = vector.broadcast %105 : vector<8x1xf32> to vector<8x8xf32>
    %107 = arith.subf %103, %106 : vector<8x8xf32>
    %108 = math.exp %107 : vector<8x8xf32>
    %cst_45 = arith.constant dense<0.000000e+00> : vector<8xf32>
    %109 = vector.multi_reduction <add>, %108, %cst_45 [1] : vector<8x8xf32> to vector<8xf32>
    %110 = vector.shape_cast %109 : vector<8xf32> to vector<8x1xf32>
    %111 = tpu.reciprocal %110 {approx = true} : vector<8x1xf32> -> vector<8x1xf32>
    %112 = vector.broadcast %111 : vector<8x1xf32> to vector<8x8xf32>
    %113 = arith.mulf %108, %112 : vector<8x8xf32>
    %cst_46 = arith.constant dense<0.000000e+00> : vector<8x8xf32>
    %114 = tpu.matmul %113, %100, %cst_46 {dimension_numbers = #tpu.dot_dimension_numbers<[1], [0], [0], [1], [0, 0, 1, 1], [], []>} : vector<8x8xf32>, vector<8x8xf32>, vector<8x8xf32> -> vector<8x8xf32>
    %c24 = arith.constant 24 : index
    %c0_47 = arith.constant 0 : index
    %115 = vector.load %arg8[%c24, %c0_47] : memref<32x32xf32, #tpu.memory_space<vmem>>, vector<8x32xf32>
    %cst_48 = arith.constant dense<0.000000e+00> : vector<8x32xf32>
    %116 = tpu.matmul %114, %115, %cst_48 {dimension_numbers = #tpu.dot_dimension_numbers<[1], [0], [0], [1], [0, 0, 1, 1], [], []>} : vector<8x8xf32>, vector<8x32xf32>, vector<8x32xf32> -> vector<8x32xf32>
    %117 = arith.addf %97, %116 : vector<8x32xf32>
    %c0_49 = arith.constant 0 : index
    %c0_50 = arith.constant 0 : index
    %118 = vector.load %arg9[%c0_49, %c0_50] : memref<1x32xf32, #tpu.memory_space<vmem>>, vector<1x32xf32>
    %119 = vector.broadcast %118 : vector<1x32xf32> to vector<8x32xf32>
    %120 = arith.addf %117, %119 : vector<8x32xf32>
    %121 = arith.addf %30, %120 : vector<8x32xf32>
    %c0_51 = arith.constant 0 : index
    %c0_52 = arith.constant 0 : index
    %122 = vector.load %arg10[%c0_51, %c0_52] : memref<1x32xf32, #tpu.memory_space<vmem>>, vector<1x32xf32>
    %c0_53 = arith.constant 0 : index
    %c0_54 = arith.constant 0 : index
    %123 = vector.load %arg11[%c0_53, %c0_54] : memref<1x32xf32, #tpu.memory_space<vmem>>, vector<1x32xf32>
    %cst_55 = arith.constant dense<0.000000e+00> : vector<8xf32>
    %124 = vector.multi_reduction <add>, %121, %cst_55 [1] : vector<8x32xf32> to vector<8xf32>
    %125 = vector.shape_cast %124 : vector<8xf32> to vector<8x1xf32>
    %cst_56 = arith.constant 3.200000e+01 : f32
    %126 = vector.broadcast %cst_56 : f32 to vector<8x1xf32>
    %127 = arith.divf %125, %126 : vector<8x1xf32>
    %128 = vector.broadcast %127 : vector<8x1xf32> to vector<8x32xf32>
    %129 = arith.subf %121, %128 : vector<8x32xf32>
    %130 = arith.mulf %129, %129 : vector<8x32xf32>
    %cst_57 = arith.constant dense<0.000000e+00> : vector<8xf32>
    %131 = vector.multi_reduction <add>, %130, %cst_57 [1] : vector<8x32xf32> to vector<8xf32>
    %132 = vector.shape_cast %131 : vector<8xf32> to vector<8x1xf32>
    %cst_58 = arith.constant 3.200000e+01 : f32
    %133 = vector.broadcast %cst_58 : f32 to vector<8x1xf32>
    %134 = arith.divf %132, %133 : vector<8x1xf32>
    %135 = vector.broadcast %127 : vector<8x1xf32> to vector<8x32xf32>
    %136 = arith.subf %121, %135 : vector<8x32xf32>
    %cst_59 = arith.constant 9.99999996E-13 : f32
    %137 = vector.broadcast %cst_59 : f32 to vector<8x1xf32>
    %138 = arith.addf %134, %137 : vector<8x1xf32>
    %139 = math.rsqrt %138 : vector<8x1xf32>
    %140 = vector.broadcast %139 : vector<8x1xf32> to vector<8x32xf32>
    %141 = arith.mulf %136, %140 : vector<8x32xf32>
    %142 = vector.broadcast %122 : vector<1x32xf32> to vector<8x32xf32>
    %143 = arith.mulf %141, %142 : vector<8x32xf32>
    %144 = vector.broadcast %123 : vector<1x32xf32> to vector<8x32xf32>
    %145 = arith.addf %143, %144 : vector<8x32xf32>
    %146 = arith.truncf %145 : vector<8x32xf32> to vector<8x32xbf16>
    %c0_60 = arith.constant 0 : index
    %c0_61 = arith.constant 0 : index
    %147 = vector.load %arg12[%c0_60, %c0_61] : memref<32x64xbf16, #tpu.memory_space<vmem>>, vector<32x64xbf16>
    %cst_62 = arith.constant dense<0.000000e+00> : vector<8x64xf32>
    %148 = tpu.matmul %146, %147, %cst_62 {dimension_numbers = #tpu.dot_dimension_numbers<[1], [0], [0], [1], [0, 0, 1, 1], [], []>} : vector<8x32xbf16>, vector<32x64xbf16>, vector<8x64xf32> -> vector<8x64xf32>
    %c0_63 = arith.constant 0 : index
    %c0_64 = arith.constant 0 : index
    %149 = vector.load %arg13[%c0_63, %c0_64] : memref<1x64xf32, #tpu.memory_space<vmem>>, vector<1x64xf32>
    %150 = vector.broadcast %149 : vector<1x64xf32> to vector<8x64xf32>
    %151 = arith.addf %148, %150 : vector<8x64xf32>
    %cst_65 = arith.constant 5.000000e-01 : f32
    %152 = vector.broadcast %cst_65 : f32 to vector<8x64xf32>
    %153 = arith.mulf %152, %151 : vector<8x64xf32>
    %cst_66 = arith.constant 4.471500e-02 : f32
    %154 = vector.broadcast %cst_66 : f32 to vector<8x64xf32>
    %155 = arith.mulf %154, %151 : vector<8x64xf32>
    %156 = arith.mulf %155, %151 : vector<8x64xf32>
    %157 = arith.mulf %156, %151 : vector<8x64xf32>
    %158 = arith.addf %151, %157 : vector<8x64xf32>
    %cst_67 = arith.constant 0.797884583 : f32
    %159 = vector.broadcast %cst_67 : f32 to vector<8x64xf32>
    %160 = arith.mulf %159, %158 : vector<8x64xf32>
    %161 = math.tanh %160 : vector<8x64xf32>
    %cst_68 = arith.constant 1.000000e+00 : f32
    %162 = vector.broadcast %cst_68 : f32 to vector<8x64xf32>
    %163 = arith.addf %162, %161 : vector<8x64xf32>
    %164 = arith.mulf %153, %163 : vector<8x64xf32>
    %165 = arith.truncf %164 : vector<8x64xf32> to vector<8x64xbf16>
    %c0_69 = arith.constant 0 : index
    %c0_70 = arith.constant 0 : index
    %166 = vector.load %arg14[%c0_69, %c0_70] : memref<64x32xbf16, #tpu.memory_space<vmem>>, vector<64x32xbf16>
    %cst_71 = arith.constant dense<0.000000e+00> : vector<8x32xf32>
    %167 = tpu.matmul %165, %166, %cst_71 {dimension_numbers = #tpu.dot_dimension_numbers<[1], [0], [0], [1], [0, 0, 1, 1], [], []>} : vector<8x64xbf16>, vector<64x32xbf16>, vector<8x32xf32> -> vector<8x32xf32>
    %c0_72 = arith.constant 0 : index
    %c0_73 = arith.constant 0 : index
    %168 = vector.load %arg15[%c0_72, %c0_73] : memref<1x32xf32, #tpu.memory_space<vmem>>, vector<1x32xf32>
    %169 = vector.broadcast %168 : vector<1x32xf32> to vector<8x32xf32>
    %170 = arith.addf %167, %169 : vector<8x32xf32>
    %171 = arith.addf %145, %170 : vector<8x32xf32>
    %c0_74 = arith.constant 0 : index
    %c0_75 = arith.constant 0 : index
    %172 = vector.load %arg16[%c0_74, %c0_75] : memref<1x32xf32, #tpu.memory_space<vmem>>, vector<1x32xf32>
    %c0_76 = arith.constant 0 : index
    %c0_77 = arith.constant 0 : index
    %173 = vector.load %arg17[%c0_76, %c0_77] : memref<1x32xf32, #tpu.memory_space<vmem>>, vector<1x32xf32>
    %cst_78 = arith.constant dense<0.000000e+00> : vector<8xf32>
    %174 = vector.multi_reduction <add>, %171, %cst_78 [1] : vector<8x32xf32> to vector<8xf32>
    %175 = vector.shape_cast %174 : vector<8xf32> to vector<8x1xf32>
    %cst_79 = arith.constant 3.200000e+01 : f32
    %176 = vector.broadcast %cst_79 : f32 to vector<8x1xf32>
    %177 = arith.divf %175, %176 : vector<8x1xf32>
    %178 = vector.broadcast %177 : vector<8x1xf32> to vector<8x32xf32>
    %179 = arith.subf %171, %178 : vector<8x32xf32>
    %180 = arith.mulf %179, %179 : vector<8x32xf32>
    %cst_80 = arith.constant dense<0.000000e+00> : vector<8xf32>
    %181 = vector.multi_reduction <add>, %180, %cst_80 [1] : vector<8x32xf32> to vector<8xf32>
    %182 = vector.shape_cast %181 : vector<8xf32> to vector<8x1xf32>
    %cst_81 = arith.constant 3.200000e+01 : f32
    %183 = vector.broadcast %cst_81 : f32 to vector<8x1xf32>
    %184 = arith.divf %182, %183 : vector<8x1xf32>
    %185 = vector.broadcast %177 : vector<8x1xf32> to vector<8x32xf32>
    %186 = arith.subf %171, %185 : vector<8x32xf32>
    %cst_82 = arith.constant 9.99999996E-13 : f32
    %187 = vector.broadcast %cst_82 : f32 to vector<8x1xf32>
    %188 = arith.addf %184, %187 : vector<8x1xf32>
    %189 = math.rsqrt %188 : vector<8x1xf32>
    %190 = vector.broadcast %189 : vector<8x1xf32> to vector<8x32xf32>
    %191 = arith.mulf %186, %190 : vector<8x32xf32>
    %192 = vector.broadcast %172 : vector<1x32xf32> to vector<8x32xf32>
    %193 = arith.mulf %191, %192 : vector<8x32xf32>
    %194 = vector.broadcast %173 : vector<1x32xf32> to vector<8x32xf32>
    %195 = arith.addf %193, %194 : vector<8x32xf32>
    %196 = tpu.iota {dimensions = array<i32: 0>} : vector<8x8xi32>
    %197 = tpu.iota {dimensions = array<i32: 1>} : vector<8x8xi32>
    %cst_83 = arith.constant 0.000000e+00 : f32
    %198 = vector.broadcast %cst_83 : f32 to vector<8x32xf32>
    %c-1_i32 = arith.constant -1 : i32
    %199 = vector.broadcast %c-1_i32 : i32 to vector<8x8xi32>
    %200 = arith.addi %196, %199 : vector<8x8xi32>
    %201 = arith.cmpi eq, %197, %200 : vector<8x8xi32>
    %202 = arith.extui %201 : vector<8x8xi1> to vector<8x8xi32>
    %203 = arith.sitofp %202 : vector<8x8xi32> to vector<8x8xf32>
    %cst_84 = arith.constant dense<0.000000e+00> : vector<8x32xf32>
    %204 = tpu.matmul %203, %195, %cst_84 {dimension_numbers = #tpu.dot_dimension_numbers<[1], [0], [0], [1], [0, 0, 1, 1], [], []>} : vector<8x8xf32>, vector<8x32xf32>, vector<8x32xf32> -> vector<8x32xf32>
    %205 = arith.truncf %204 : vector<8x32xf32> to vector<8x32xbf16>
    %c0_85 = arith.constant 0 : index
    %c0_86 = arith.constant 0 : index
    %c0_87 = arith.constant 0 : index
    %206 = vector.load %arg18[%c0_85, %c0_86, %c0_87] : memref<3x32x32xbf16, #tpu.memory_space<vmem>>, vector<1x32x32xbf16>
    %207 = vector.shape_cast %206 : vector<1x32x32xbf16> to vector<32x32xbf16>
    %cst_88 = arith.constant dense<0.000000e+00> : vector<8x32xf32>
    %208 = tpu.matmul %205, %207, %cst_88 {dimension_numbers = #tpu.dot_dimension_numbers<[1], [0], [0], [1], [0, 0, 1, 1], [], []>} : vector<8x32xbf16>, vector<32x32xbf16>, vector<8x32xf32> -> vector<8x32xf32>
    %209 = arith.addf %198, %208 : vector<8x32xf32>
    %c0_i32 = arith.constant 0 : i32
    %210 = vector.broadcast %c0_i32 : i32 to vector<8x8xi32>
    %211 = arith.addi %196, %210 : vector<8x8xi32>
    %212 = arith.cmpi eq, %197, %211 : vector<8x8xi32>
    %213 = arith.extui %212 : vector<8x8xi1> to vector<8x8xi32>
    %214 = arith.sitofp %213 : vector<8x8xi32> to vector<8x8xf32>
    %cst_89 = arith.constant dense<0.000000e+00> : vector<8x32xf32>
    %215 = tpu.matmul %214, %195, %cst_89 {dimension_numbers = #tpu.dot_dimension_numbers<[1], [0], [0], [1], [0, 0, 1, 1], [], []>} : vector<8x8xf32>, vector<8x32xf32>, vector<8x32xf32> -> vector<8x32xf32>
    %216 = arith.truncf %215 : vector<8x32xf32> to vector<8x32xbf16>
    %c1 = arith.constant 1 : index
    %c0_90 = arith.constant 0 : index
    %c0_91 = arith.constant 0 : index
    %217 = vector.load %arg18[%c1, %c0_90, %c0_91] : memref<3x32x32xbf16, #tpu.memory_space<vmem>>, vector<1x32x32xbf16>
    %218 = vector.shape_cast %217 : vector<1x32x32xbf16> to vector<32x32xbf16>
    %cst_92 = arith.constant dense<0.000000e+00> : vector<8x32xf32>
    %219 = tpu.matmul %216, %218, %cst_92 {dimension_numbers = #tpu.dot_dimension_numbers<[1], [0], [0], [1], [0, 0, 1, 1], [], []>} : vector<8x32xbf16>, vector<32x32xbf16>, vector<8x32xf32> -> vector<8x32xf32>
    %220 = arith.addf %209, %219 : vector<8x32xf32>
    %c1_i32 = arith.constant 1 : i32
    %221 = vector.broadcast %c1_i32 : i32 to vector<8x8xi32>
    %222 = arith.addi %196, %221 : vector<8x8xi32>
    %223 = arith.cmpi eq, %197, %222 : vector<8x8xi32>
    %224 = arith.extui %223 : vector<8x8xi1> to vector<8x8xi32>
    %225 = arith.sitofp %224 : vector<8x8xi32> to vector<8x8xf32>
    %cst_93 = arith.constant dense<0.000000e+00> : vector<8x32xf32>
    %226 = tpu.matmul %225, %195, %cst_93 {dimension_numbers = #tpu.dot_dimension_numbers<[1], [0], [0], [1], [0, 0, 1, 1], [], []>} : vector<8x8xf32>, vector<8x32xf32>, vector<8x32xf32> -> vector<8x32xf32>
    %227 = arith.truncf %226 : vector<8x32xf32> to vector<8x32xbf16>
    %c2 = arith.constant 2 : index
    %c0_94 = arith.constant 0 : index
    %c0_95 = arith.constant 0 : index
    %228 = vector.load %arg18[%c2, %c0_94, %c0_95] : memref<3x32x32xbf16, #tpu.memory_space<vmem>>, vector<1x32x32xbf16>
    %229 = vector.shape_cast %228 : vector<1x32x32xbf16> to vector<32x32xbf16>
    %cst_96 = arith.constant dense<0.000000e+00> : vector<8x32xf32>
    %230 = tpu.matmul %227, %229, %cst_96 {dimension_numbers = #tpu.dot_dimension_numbers<[1], [0], [0], [1], [0, 0, 1, 1], [], []>} : vector<8x32xbf16>, vector<32x32xbf16>, vector<8x32xf32> -> vector<8x32xf32>
    %231 = arith.addf %220, %230 : vector<8x32xf32>
    %c0_97 = arith.constant 0 : index
    %c0_98 = arith.constant 0 : index
    %c0_99 = arith.constant 0 : index
    %232 = vector.load %arg19[%c0_97, %c0_98, %c0_99] : memref<1x8x32xf32, #tpu.memory_space<vmem>>, vector<1x8x32xf32>
    %233 = vector.shape_cast %232 : vector<1x8x32xf32> to vector<8x32xf32>
    %234 = vector.shape_cast %231 : vector<8x32xf32> to vector<1x8x32xf32>
    tpu.vector_store %arg19[%c0_97, %c0_98, %c0_99], %234 {strides = array<i32>} : memref<1x8x32xf32, #tpu.memory_space<vmem>>, vector<1x8x32xf32>,
    return
  }
  func.func @transform_0(%arg0: i32) -> (i32, i32, i32) {
    %c0_i32 = arith.constant 0 : i32
    %c0_i32_0 = arith.constant 0 : i32
    %c0_i32_1 = arith.constant 0 : i32
    return %arg0, %c0_i32, %c0_i32_0 : i32, i32, i32
  }
  func.func @transform_1(%arg0: i32) -> (i32, i32) {
    %c0_i32 = arith.constant 0 : i32
    %c0_i32_0 = arith.constant 0 : i32
    %c0_i32_1 = arith.constant 0 : i32
    return %c0_i32, %c0_i32_0 : i32, i32
  }
  func.func @transform_2(%arg0: i32) -> (i32, i32) {
    %c0_i32 = arith.constant 0 : i32
    %c0_i32_0 = arith.constant 0 : i32
    %c0_i32_1 = arith.constant 0 : i32
    return %c0_i32, %c0_i32_0 : i32, i32
  }
  func.func @transform_3(%arg0: i32) -> (i32, i32) {
    %c0_i32 = arith.constant 0 : i32
    %c0_i32_0 = arith.constant 0 : i32
    %c0_i32_1 = arith.constant 0 : i32
    return %c0_i32, %c0_i32_0 : i32, i32
  }
  func.func @transform_4(%arg0: i32) -> (i32, i32) {
    %c0_i32 = arith.constant 0 : i32
    %c0_i32_0 = arith.constant 0 : i32
    %c0_i32_1 = arith.constant 0 : i32
    return %c0_i32, %c0_i32_0 : i32, i32
  }
  func.func @transform_5(%arg0: i32) -> (i32, i32) {
    %c0_i32 = arith.constant 0 : i32
    %c0_i32_0 = arith.constant 0 : i32
    %c0_i32_1 = arith.constant 0 : i32
    return %c0_i32, %c0_i32_0 : i32, i32
  }
  func.func @transform_6(%arg0: i32) -> (i32, i32) {
    %c0_i32 = arith.constant 0 : i32
    %c0_i32_0 = arith.constant 0 : i32
    %c0_i32_1 = arith.constant 0 : i32
    return %c0_i32, %c0_i32_0 : i32, i32
  }
  func.func @transform_7(%arg0: i32) -> (i32, i32) {
    %c0_i32 = arith.constant 0 : i32
    %c0_i32_0 = arith.constant 0 : i32
    %c0_i32_1 = arith.constant 0 : i32
    return %c0_i32, %c0_i32_0 : i32, i32
  }
  func.func @transform_8(%arg0: i32) -> (i32, i32) {
    %c0_i32 = arith.constant 0 : i32
    %c0_i32_0 = arith.constant 0 : i32
    %c0_i32_1 = arith.constant 0 : i32
    return %c0_i32, %c0_i32_0 : i32, i32
  }
  func.func @transform_9(%arg0: i32) -> (i32, i32) {
    %c0_i32 = arith.constant 0 : i32
    %c0_i32_0 = arith.constant 0 : i32
    %c0_i32_1 = arith.constant 0 : i32
    return %c0_i32, %c0_i32_0 : i32, i32
  }
  func.func @transform_10(%arg0: i32) -> (i32, i32) {
    %c0_i32 = arith.constant 0 : i32
    %c0_i32_0 = arith.constant 0 : i32
    %c0_i32_1 = arith.constant 0 : i32
    return %c0_i32, %c0_i32_0 : i32, i32
  }
  func.func @transform_11(%arg0: i32) -> (i32, i32) {
    %c0_i32 = arith.constant 0 : i32
    %c0_i32_0 = arith.constant 0 : i32
    %c0_i32_1 = arith.constant 0 : i32
    return %c0_i32, %c0_i32_0 : i32, i32
  }
  func.func @transform_12(%arg0: i32) -> (i32, i32) {
    %c0_i32 = arith.constant 0 : i32
    %c0_i32_0 = arith.constant 0 : i32
    %c0_i32_1 = arith.constant 0 : i32
    return %c0_i32, %c0_i32_0 : i32, i32
  }
  func.func @transform_13(%arg0: i32) -> (i32, i32) {
    %c0_i32 = arith.constant 0 : i32
    %c0_i32_0 = arith.constant 0 : i32
    %c0_i32_1 = arith.constant 0 : i32
    return %c0_i32, %c0_i32_0 : i32, i32
  }
  func.func @transform_14(%arg0: i32) -> (i32, i32) {
    %c0_i32 = arith.constant 0 : i32
    %c0_i32_0 = arith.constant 0 : i32
    %c0_i32_1 = arith.constant 0 : i32
    return %c0_i32, %c0_i32_0 : i32, i32
  }
  func.func @transform_15(%arg0: i32) -> (i32, i32) {
    %c0_i32 = arith.constant 0 : i32
    %c0_i32_0 = arith.constant 0 : i32
    %c0_i32_1 = arith.constant 0 : i32
    return %c0_i32, %c0_i32_0 : i32, i32
  }
  func.func @transform_16(%arg0: i32) -> (i32, i32) {
    %c0_i32 = arith.constant 0 : i32
    %c0_i32_0 = arith.constant 0 : i32
    %c0_i32_1 = arith.constant 0 : i32
    return %c0_i32, %c0_i32_0 : i32, i32
  }
  func.func @transform_17(%arg0: i32) -> (i32, i32, i32) {
    %c0_i32 = arith.constant 0 : i32
    %c0_i32_0 = arith.constant 0 : i32
    %c0_i32_1 = arith.constant 0 : i32
    %c0_i32_2 = arith.constant 0 : i32
    return %c0_i32, %c0_i32_0, %c0_i32_1 : i32, i32, i32
  }
  func.func @transform_18(%arg0: i32) -> (i32, i32, i32) {
    %c0_i32 = arith.constant 0 : i32
    %c0_i32_0 = arith.constant 0 : i32
    %c0_i32_1 = arith.constant 0 : i32
    return %arg0, %c0_i32, %c0_i32_0 : i32, i32, i32
  }
}

</mosaic_0001>

<bundles_post_ra>
// kernel: bert_cnn_forward.1
= control target key start
LH: loop header
LB: loop body
LE: loop exit
PB: predicated region body
PF: predicated region fallthrough
CT: control target
= control target key end

     0   :  { %s3203_s0 = inlined_call_operand.vmem [shape: f32[2,8,32], index: 0, kind: input, shape index: {}]   ;;  %s3204_s1 = inlined_call_operand.vmem [shape: f32[8,32], index: 1, kind: input, shape index: {}]   ;;  %s3205_s2 = inlined_call_operand.vmem [shape: f32[1,32], index: 2, kind: input, shape index: {}]   ;;  %s3206_s3 = inlined_call_operand.vmem [shape: f32[1,32], index: 3, kind: input, shape index: {}]   ;;  %s3207_s4 = inlined_call_operand.vmem [shape: f32[1,32], index: 4, kind: input, shape index: {}]   ;;  %s3208_s5 = inlined_call_operand.vmem [shape: bf16[32,96], index: 5, kind: input, shape index: {}]   ;;  %s3209_s6 = inlined_call_operand.vmem [shape: f32[1,96], index: 6, kind: input, shape index: {}]   ;;  %s3210_s7 = inlined_call_operand.vmem [shape: f32[32,32], index: 7, kind: input, shape index: {}]   ;;  %s3211_s8 = inlined_call_operand.vmem [shape: f32[1,32], index: 8, kind: input, shape index: {}]   ;;  %s3212_s9 = inlined_call_operand.vmem [shape: f32[1,32], index: 9, kind: input, shape index: {}]   ;;  %s3213_s10 = inlined_call_operand.vmem [shape: f32[1,32], index: 10, kind: input, shape index: {}]   ;;  %s3214_s11 = inlined_call_operand.vmem [shape: bf16[32,64], index: 11, kind: input, shape index: {}]   ;;  %s3215_s12 = inlined_call_operand.vmem [shape: f32[1,64], index: 12, kind: input, shape index: {}]   ;;  %s3216_s13 = inlined_call_operand.vmem [shape: bf16[64,32], index: 13, kind: input, shape index: {}]   ;;  %s3217_s14 = inlined_call_operand.vmem [shape: f32[1,32], index: 14, kind: input, shape index: {}]   ;;  %s3218_s15 = inlined_call_operand.vmem [shape: f32[1,32], index: 15, kind: input, shape index: {}]   ;;  %s3219_s16 = inlined_call_operand.vmem [shape: f32[1,32], index: 16, kind: input, shape index: {}]   ;;  %s3220_s17 = inlined_call_operand.vmem [shape: bf16[3,32,32], index: 17, kind: input, shape index: {}]   ;;  %s3221_s18 = inlined_call_operand.hbm [shape: f32[2,8,32], index: 18, kind: output, shape index: {}]  }
   0x1   :  { %3228 = sst [smem:[#allocation10_spill]] %s3203_s0 }
   0x2   :  { %3229 = sst [smem:[#allocation11_spill]] %s3204_s1 }
   0x3   :  { %3230 = sst [smem:[#allocation12_spill]] %s3205_s2 }
   0x4   :  { %3231 = sst [smem:[#allocation13_spill]] %s3221_s18 }
   0x5   :  { %23 = vsyncpa [#allocation3], 0 }
   0x6   :  { %25 = vsyncpa [#allocation3 + $0x1], 0  ;;  %s2881_s27 = smov 0   ;;  %s2883_s28 = smov 0  }
   0x7   :  { %s2885_s29 = smov 0   ;;  %s2887_s30 = smov 0  }
   0x8 LB: > { %3232 = sst [smem:[#allocation5_spill]] %s2758_s27  ;;  %s2902_s0 = sadd.s32 4294967295, %s2770_s30   ;;  %s2770_s30 = sphi %s2887_s30, %s3245_s30   ;;  %s2766_s29 = sphi %s2885_s29, %s3247_s29   ;;  %s2762_s28 = sphi %s2883_s28, %s3249_s28   ;;  %s2758_s27 = sphi %s2881_s27, %s3248_s27  }
   0x9   : > { %3233 = sst [smem:[#allocation6_spill]] %s2766_s29  ;;  %s2362_s19 = sadd.s32 4294967294, %s2770_s30  }
   0xa   : > { %s2906_s1 = sadd.s32 1, %s2770_s30   ;;  %s421_s20 = sadd.s32 1, %s2766_s29 }
   0xb   : > { %3234 = sst [smem:[#allocation7_spill]] %s2906_s1  ;;  %s418_s21 = ssub.s32 %s2770_s30, %s2906_s1 }
   0xc   : > { %p431_p0 = scmp.ne.s32.totalorder %s2766_s29, %s2762_s28  ;;  %p419_p1 = scmp.eq.s32.totalorder %s418_s21, 0 }
   0xd   : > { %p432_p2 = scmp.eq.s32.totalorder %s2902_s0, 1  ;;  %p437_p3 = scmp.ne.s32.totalorder %s2762_s28, %s2758_s27 }
   0xe   : > { %p438_p4 = scmp.eq.s32.totalorder %s2362_s19, 1  ;;  %p2365_p7 = scmp.ge.s32.totalorder %s2770_s30, 1 }
   0xf   : > { %s2917_s22 = scalar_select %p419_p1, %s2766_s29, %s421_s20  }
  0x10   : > { %p2919_p5 = por %p432_p2, %p431_p0  ;;  %p2923_p6 = por %p438_p4, %p437_p3 }
  0x11   : > { %3235 = sst [smem:[#allocation8_spill]] %s2917_s22  ;;  %p514_p8 = scmp.lt.s32.totalorder %s2770_s30, 3 }
  0x12   : > { %s3237_s23 = scalar_select %p2923_p6, 1, 0 }
  0x13   : > { %p515_p9 = pnand %p2365_p7, %p514_p8 }
  0x14   : > { %3238 = sst [smem:[#allocation9_spill]] %s3237_s23  ;;  %p567_p10 = scmp.lt.s32.totalorder (!%p515_p9), %s2902_s0, 1  ;;  %vm585_vm0 = vcmask (!%p515_p9), 261120   ;;  %v2670_v11 = vld [vmem:[%s3208_s5] sm:$0xff] (!%p515_p9)   ;;  %v2772_v12 = vmov (!%p515_p9), 0.0   ;;  %v2671_v13 = vld [vmem:[%s3208_s5 + $0x8] sm:$0xff] (!%p515_p9)  }
  0x15   : > { %518 = sbr.rel (%p515_p9) target bundleno = 5005 (0x138d), region = 92  ;;  %s3239_s20 = sld [smem:[#allocation11_spill]] (!%p515_p9)  ;;  %2483 = vmatprep.subr.bf16.mxu1 (!%p515_p9), %v2772_v12  ;;  %2506 = vmatprep.subr.mxu0 (!%p515_p9), %v2772_v12  ;;  %vm2773_vm1 = vmmov (!%p515_p9), 0   ;;  %v2369_v18 = vld [vmem:[%s3206_s3] ss:$0 sm:$0xff] (!%p515_p9)  ;;  %vm684_vm2 = vcmask (!%p515_p9), 64512  }
  0x16   : > { %s3240_s29 = sld [smem:[#allocation12_spill]] (!%p515_p9)  ;;  %s3241_s23 = sld [smem:[#allocation10_spill]] (!%p515_p9)  ;;  %2484 = vmatpush3.bf16.msra.mxu1 (!%p515_p9), %v2670_v11  ;;  %2487 = vmatprep.mubr.msk.bf16.mxu1 (!%p515_p9), %vm2773_vm1, %v2772_v12  ;;  %v2370_v20 = vld [vmem:[%s3207_s4] ss:$0 sm:$0xff] (!%p515_p9)  ;;  %v1014_v58 = vld [vmem:[%s3210_s7 + $0x8] sm:$0xff] (!%p515_p9)  ;;  %vm1797_vm3 = vcmask (!%p515_p9), 523264  }
  0x17   : > { %2485 = vmatprep.subr.bf16.mxu1 (!%p515_p9), %v2772_v12  ;;  %2508 = vmatprep.mubr.msk.f32.mxu0 (!%p515_p9), %vm2773_vm1, %v2772_v12  ;;  %v2371_v24 = vld [vmem:[%s3209_s6] ss:$0 sm:$0xff] (!%p515_p9)  ;;  %s2775_s21 = smov (!%p515_p9), 96   ;;  %s2776_s22 = smov (!%p515_p9), 88  }
  0x18   : > { %s2779_s27 = smov (!%p515_p9), 80   ;;  %s2780_s1 = smov (!%p515_p9), 112   ;;  %v847_v62 = vld [vmem:[%s3210_s7] sm:$0xff] (!%p515_p9) }
  0x19   : > { %s2430_s19 = sshll.u32 (!%p515_p9), %s2902_s0, 7 }
  0x1a   : > { %2486 = vmatpush3.bf16.msra.mxu1 (!%p515_p9), %v2671_v13 }
  0x1b   : > { %v573_v0 = vld [vmem:[%s3239_s20] sm:$0xff] (!%p515_p9)  ;;  %2491 = vmatprep.subr.mxu1 (!%p515_p9), %v2772_v12  ;;  %s2774_s20 = smov (!%p515_p9), 64  }
  0x1c   : > { %s568_s24 = scalar_select %p567_p10, %s2902_s0, 1  ;;  %v2368_v1 = vld [vmem:[%s3240_s29] ss:$0 sm:$0xff] }
  0x1d   : > { %s2777_s29 = smov 120   ;;  %s2785_s0 = smov [#allocation2]  }
  0x1e   : > { %s2367_s25 = sshll.u32 %s568_s24, 3  ;;  %s2782_s24 = smov 72  }
  0x1f   : > { %s570_s18 = scalar_lea.vmem %s3241_s23, %s2367_s25  ;;  %s2781_s23 = smov 48  }
  0x20   : > { %v572_v2 = vld [vmem:[%s570_s18] sm:$0xff]  ;;  %s2778_s18 = smov 56   ;;  %s564_s25 = sand.u32 1, %s2762_s28  }
  0x21   : > { %v574_v3 = vadd.f32 %v573_v0, %v572_v2  ;;  %s2366_s26 = sshll.u32 %s564_s25, 3 }
  0x23   : > { %v582_v4 = vadd.f32 %v2368_v1, %v574_v3 }
  0x25   : > { %v586_v5 = vsel %vm585_vm0, %v582_v4, 0.0 }
  0x26   : > { %587 = vadd.xlane.f32.xlu0 %v586_v5 }
  0xb3   : > { %v588_v6 = vpop.xlane.xlu0 %587 }
  0xb4   : > { %v590_v7 = vmul.f32 0.03125, %v588_v6 }
  0xb6   : > { %v591_v8 = vsub.f32 %v582_v4, %v590_v7 }
  0xb8   : > { %v592_v9 = vmul.f32 %v591_v8, %v591_v8 }
  0xba   : > { %v593_v10 = vsel %vm585_vm0, %v592_v9, 0.0 }
  0xbb   : > { %594 = vadd.xlane.f32.xlu0 %v593_v10 }
 0x148   : > { %v595_v14 = vpop.xlane.xlu0 %594 }
 0x149   : > { %v596_v15 = vmul.f32 0.03125, %v595_v14 }
 0x14b   : > { %v597_v16 = vadd.f32 1e-12, %v596_v15 }
 0x14d   : > { %2684 = vrsqrt.f32 %v597_v16 }
 0x157   : > { %v2685_v17 = vpop.eup %2684 }
 0x158   : > { %v599_v19 = vmul.f32 %v2685_v17, %v591_v8 }
 0x15a   : > { %v606_v21 = vmul.f32 %v2369_v18, %v599_v19 }
 0x15c   : > { %v2962_v22 = vadd.f32 %v2370_v20, %v606_v21 }
 0x15e   : > { %v614_v23 = vpack.c.bf16 %v2962_v22, %v2962_v22 }
 0x160   : > { %2488 = vmatmul.mubr.msk.bf16.vlgmr.msra.gmra.mrb[0].mxu1 %vm585_vm0, %v614_v23 }
 0x161   : > { %2493 = vmatprep.mubr.msk.f32.mxu1 %vm2773_vm1, %v2772_v12 }
 0x233   : > { %v675_v25 = vpop.f32.mrb[0].mxu1 }
 0x234   : > { %v2972_v26 = vadd.f32 %v2371_v24, %v675_v25  ;;  %v2489_v27 = vpop.f32.mrb[1].mxu1  ;;  %v1327_v25 = vld [vmem:[%s3210_s7 + $0x10] sm:$0xff] }
 0x235   : > { %v678_v28 = vpop.f32.mrb[2].mxu1 }
 0x236   : > { %771 = vrot.lane.b32.xlu0 %v2972_v26, %s2774_s20  ;;  %682 = vrot.lane.b32.xlu1 %v2972_v26, %s2775_s21  ;;  %v2490_v29 = vpop.f32.mrb[3].mxu1  ;;  %s2783_s21 = smov 104   ;;  %s566_s20 = scalar_lea.vmem [#allocation2], %s2366_s26 }
 0x23a   : > { %850 = vrot.lane.b32.xlu0 %v2972_v26, %s2776_s22 }
 0x2a8   : > { %v683_v30 = vpop.permute.xlu1 %682  ;;  %v772_v31 = vpop.permute.xlu0 %771 }
 0x2a9   : > { %2492 = vmatpush3.xpose.msk.msra.mxu1 %vm684_vm2, %v683_v30 }
 0x2aa   : > { %2496 = vmatprep.subr.mxu1 %v2772_v12 }
 0x2ac   : > { %2494 = vmatmul.mubr.msk.f32.vlgmr.msra.gmra.mrb[4].mxu1 %vm684_vm2, %v2972_v26  ;;  %v851_v41 = vpop.permute.xlu0 %850 }
 0x2ad   : > { %2497 = vmatpush3.msra.mxu1 %v772_v31  ;;  %2498 = vmatprep.mubr.msk.f32.mxu1 %vm2773_vm1, %v2772_v12 }
 0x2ae   : > { %2501 = vmatprep.subr.mxu1 %v2772_v12 }
 0x37f   : > { %v755_v32 = vpop.f32.mrb[4].mxu1 }
 0x380   : > { %v759_v33 = vmul.f32 0.35355338, %v755_v32  ;;  %v2495_v34 = vpop.f32.mrb[5].mxu1 }
 0x382   : > { %v760_v35 = vsel %vm684_vm2, %v759_v33, -inf }
 0x383   : > { %761 = vmax.xlane.f32.xlu1 %v760_v35 }
 0x410   : > { %v762_v36 = vpop.xlane.xlu1 %761 }
 0x411   : > { %v763_v37 = vsub.f32 %v759_v33, %v762_v36 }
 0x413   : > { %v764_v38 = vmul.f32 1.442695, %v763_v37 }
 0x415   : > { %2686 = vpow2.f32 %v764_v38 }
 0x41f   : > { %v2687_v39 = vpop.eup %2686 }
 0x420   : > { %v766_v40 = vsel %vm684_vm2, %v2687_v39, 0.0 }
 0x421   : > { %767 = vadd.xlane.f32.xlu0 %v766_v40 }
 0x437   : > { %848 = vrot.lane.b32.xlu0 %v2972_v26, %s2777_s29 }
 0x4ae   : > { %v768_v42 = vpop.xlane.xlu0 %767 }
 0x4af   : > { %2688 = vrcp.f32 %v768_v42 }
 0x4b2   : > { %v849_v45 = vpop.permute.xlu0 %848 }
 0x4b9   : > { %v2689_v43 = vpop.eup %2688 }
 0x4ba   : > { %v770_v44 = vmul.f32 %v2689_v43, %v2687_v39 }
 0x4bc   : > { %2499 = vmatmul.mubr.msk.f32.vlgmr.msra.gmra.mrb[6].mxu1 %vm684_vm2, %v770_v44 }
 0x4bd   : > { %2502 = vmatpush3.xpose.msk.msra.mxu1 %vm684_vm2, %v851_v41  ;;  %2503 = vmatprep.mubr.msk.f32.mxu1 %vm2773_vm1, %v2772_v12 }
 0x4be   : > { %2511 = vmatprep.subr.mxu1 %v2772_v12 }
 0x4c0   : > { %2504 = vmatmul.mubr.msk.f32.vlgmr.msra.gmra.mrb[8].mxu1 %vm684_vm2, %v849_v45 }
 0x4c1   : > { %2513 = vmatprep.mubr.msk.f32.mxu1 %vm2773_vm1, %v2772_v12  ;;  %2512 = vmatpush3.msra.mxu1 %v1014_v58 }
 0x4c2   : > { %2521 = vmatprep.subr.mxu1 %v2772_v12 }
 0x58f   : > { %v843_v46 = vpop.f32.mrb[6].mxu1 }
 0x590   : > { %v2500_v47 = vpop.f32.mrb[7].mxu1 }
 0x593   : > { %v922_v48 = vpop.f32.mrb[8].mxu1 }
 0x594   : > { %v926_v49 = vmul.f32 0.35355338, %v922_v48  ;;  %v2505_v50 = vpop.f32.mrb[9].mxu1  ;;  %v2391_v48 = vld [vmem:[%s3211_s8] ss:$0 sm:$0xff] }
 0x596   : > { %v927_v51 = vsel %vm684_vm2, %v926_v49, -inf }
 0x597   : > { %928 = vmax.xlane.f32.xlu1 %v927_v51 }
 0x5a8   : > { %938 = vrot.lane.b32.xlu1 %v2972_v26, %s2778_s18  ;;  %s2784_s18 = smov 40  }
 0x5ac   : > { %1163 = vrot.lane.b32.xlu1 %v2972_v26, %s2779_s27 }
 0x5b0   : > { %1161 = vrot.lane.b32.xlu1 %v2972_v26, %s2780_s1  ;;  %s2290_s1 = scalar_lea.sflag [#allocation3], %s564_s25 }
 0x624   : > { %v929_v52 = vpop.xlane.xlu1 %928 }
 0x625   : > { %v930_v53 = vsub.f32 %v926_v49, %v929_v52 }
 0x627   : > { %v931_v54 = vmul.f32 1.442695, %v930_v53 }
 0x628   : > { %v939_v55 = vpop.permute.xlu1 %938 }
 0x629   : > { %2690 = vpow2.f32 %v931_v54  ;;  %2507 = vmatpush3.msra.mxu0 %v939_v55 }
 0x62a   : > { %2516 = vmatprep.subr.mxu0 %v2772_v12 }
 0x62c   : > { %v1164_v0 = vpop.permute.xlu1 %1163 }
 0x630   : > { %v1162_v3 = vpop.permute.xlu1 %1161 }
 0x633   : > { %v2691_v56 = vpop.eup %2690 }
 0x634   : > { %v933_v57 = vsel %vm684_vm2, %v2691_v56, 0.0 }
 0x635   : > { %934 = vadd.xlane.f32.xlu0 %v933_v57 }
 0x64b   : > { %1251 = vrot.lane.b32.xlu0 %v2972_v26, %s2781_s23 }
 0x64f   : > { %1404 = vrot.lane.b32.xlu0 %v2972_v26, %s2782_s24  ;;  %s2712_s24 = sshll.u32 %s2785_s0, 4  ;;  %s2713_s24 = int_to_ptr.vmem [resolvable:$false] %s2712_s24 }
 0x650   : > { %s2714_s26 = scalar_lea.vmem %s2713_s24, 256 }
 0x6c2   : > { %v935_v59 = vpop.xlane.xlu0 %934 }
 0x6c3   : > { %2692 = vrcp.f32 %v935_v59  ;;  %v2672_v59 = vld [vmem:[%s3214_s11] sm:$0xff]  }
 0x6c6   : > { %v1252_v63 = vpop.permute.xlu0 %1251 }
 0x6ca   : > { %v1405_v19 = vpop.permute.xlu0 %1404 }
 0x6cd   : > { %v2693_v60 = vpop.eup %2692 }
 0x6ce   : > { %v937_v61 = vmul.f32 %v2693_v60, %v2691_v56  ;;  %v2673_v60 = vld [vmem:[%s3214_s11 + $0x8] sm:$0xff]  }
 0x6d0   : > { %2509 = vmatmul.mubr.msk.f32.vlgmr.msra.gmra.mrb[0].mxu0 %vm684_vm2, %v937_v61 }
 0x6d1   : > { %2517 = vmatpush3.msra.mxu0 %v847_v62  ;;  %2518 = vmatprep.mubr.msk.f32.mxu0 %vm2773_vm1, %v2772_v12 }
 0x6d2   : > { %2526 = vmatprep.subr.mxu0 %v2772_v12 }
 0x6d4   : > { %2519 = vmatmul.mubr.msk.f32.vlgmr.msra.gmra.mrb[2].mxu0 %vm684_vm2, %v843_v46 }
 0x6d5   : > { %2527 = vmatpush3.msra.mxu0 %v1252_v63  ;;  %2528 = vmatprep.mubr.msk.f32.mxu0 %vm2773_vm1, %v2772_v12 }
 0x6d6   : > { %2536 = vmatprep.subr.mxu0 %v2772_v12 }
 0x7a3   : > { %v1010_v1 = vpop.f32.mrb[0].mxu0 }
 0x7a4   : > { %v2510_v2 = vpop.f32.mrb[1].mxu0  ;;  %2514 = vmatmul.mubr.msk.f32.vlgmr.msra.gmra.mrb[10].mxu1 %vm684_vm2, %v1010_v1 }
 0x7a5   : > { %2522 = vmatpush3.xpose.msk.msra.mxu1 %vm684_vm2, %v1164_v0  ;;  %2523 = vmatprep.mubr.msk.f32.mxu1 %vm2773_vm1, %v2772_v12  ;;  %v2392_v0 = vld [vmem:[%s3212_s9] ss:$0 sm:$0xff] }
 0x7a6   : > { %2531 = vmatprep.subr.mxu1 %v2772_v12  ;;  %v2393_v2 = vld [vmem:[%s3213_s10] ss:$0 sm:$0xff] }
 0x7a7   : > { %v1157_v4 = vpop.f32.mrb[2].mxu0 }
 0x7a8   : > { %v2520_v5 = vpop.f32.mrb[3].mxu0  ;;  %2524 = vmatmul.mubr.msk.f32.vlgmr.msra.gmra.mrb[12].mxu1 %vm684_vm2, %v1162_v3 }
 0x7a9   : > { %2533 = vmatprep.mubr.msk.f32.mxu1 %vm2773_vm1, %v2772_v12  ;;  %2532 = vmatpush3.msra.mxu1 %v1327_v25 }
 0x7aa   : > { %2541 = vmatprep.subr.mxu1 %v2772_v12 }
 0x877   : > { %v1084_v6 = vpop.f32.mrb[10].mxu1 }
 0x878   : > { %v1158_v7 = vadd.f32 %v1157_v4, %v1084_v6  ;;  %v2515_v8 = vpop.f32.mrb[11].mxu1  ;;  %v2674_v6 = vld [vmem:[%s3216_s13] sm:$0xff]  }
 0x879   : > { %v2676_v8 = vld [vmem:[%s3216_s13 + $0x10] sm:$0xff]  }
 0x87b   : > { %v1235_v9 = vpop.f32.mrb[12].mxu1 }
 0x87c   : > { %v1239_v10 = vmul.f32 0.35355338, %v1235_v9  ;;  %v2525_v11 = vpop.f32.mrb[13].mxu1  ;;  %v2677_v9 = vld [vmem:[%s3216_s13 + $0x18] sm:$0xff]  }
 0x87e   : > { %v1240_v13 = vsel %vm684_vm2, %v1239_v10, -inf }
 0x87f   : > { %1241 = vmax.xlane.f32.xlu1 %v1240_v13 }
 0x90c   : > { %v1242_v14 = vpop.xlane.xlu1 %1241 }
 0x90d   : > { %v1243_v15 = vsub.f32 %v1239_v10, %v1242_v14  ;;  %v2394_v10 = vld [vmem:[%s3215_s12] ss:$0 sm:$0xff] }
 0x90f   : > { %v1244_v16 = vmul.f32 1.442695, %v1243_v15 }
 0x911   : > { %2694 = vpow2.f32 %v1244_v16 }
 0x91b   : > { %v2695_v17 = vpop.eup %2694 }
 0x91c   : > { %v1246_v18 = vsel %vm684_vm2, %v2695_v17, 0.0 }
 0x91d   : > { %1247 = vadd.xlane.f32.xlu0 %v1246_v18 }
 0x933   : > { %1402 = vrot.lane.b32.xlu0 %v2972_v26, %s2783_s21  ;;  %s2303_s21 = sshll.u32 %s566_s20, 4  ;;  %s3162_s21 = int_to_ptr.vmem [resolvable:$true] %s2303_s21 }
 0x934   : > { %s2708_s23 = scalar_lea.vmem %s3162_s21, 128  ;;  %p2715_p0 = scmp.lt.s32.totalorder %s3162_s21, %s2713_s24 }
 0x935   : > { %p2709_p11 = scmp.ne.s32.totalorder %s3162_s21, %s2708_s23  ;;  %p2716_p1 = scmp.lt.s32.totalorder %s2714_s26, %s2708_s23 }
 0x937   : > { %p2710_p12 = pnand %p2709_p11, %p2919_p5  ;;  %p2717_p2 = por %p2716_p1, %p2715_p0 }
 0x939   : > { %p2711_p13 = pneg %p2710_p12 }
 0x93b   : > { %p2718_p3 = pnand %p2717_p2, %p2711_p13 }
 0x9aa   : > { %v1248_v20 = vpop.xlane.xlu0 %1247 }
 0x9ab   : > { %2696 = vrcp.f32 %v1248_v20 }
 0x9ae   : > { %v1403_v24 = vpop.permute.xlu0 %1402 }
 0x9b5   : > { %v2697_v21 = vpop.eup %2696 }
 0x9b6   : > { %v1250_v23 = vmul.f32 %v2697_v21, %v2695_v17 }
 0x9b8   : > { %2529 = vmatmul.mubr.msk.f32.vlgmr.msra.gmra.mrb[4].mxu0 %vm684_vm2, %v1250_v23 }
 0x9b9   : > { %2537 = vmatpush3.xpose.msk.msra.mxu0 %vm684_vm2, %v1405_v19  ;;  %2538 = vmatprep.mubr.msk.f32.mxu0 %vm2773_vm1, %v2772_v12 }
 0x9ba   : > { %2546 = vmatprep.subr.mxu0 %v2772_v12 }
 0x9bc   : > { %2539 = vmatmul.mubr.msk.f32.vlgmr.msra.gmra.mrb[6].mxu0 %vm684_vm2, %v1403_v24 }
 0x9bd   : > { %2548 = vmatprep.mubr.msk.f32.mxu0 %vm2773_vm1, %v2772_v12 }
 0xa8b   : > { %v1323_v27 = vpop.f32.mrb[4].mxu0 }
 0xa8c   : > { %v2530_v28 = vpop.f32.mrb[5].mxu0  ;;  %2534 = vmatmul.mubr.msk.f32.vlgmr.msra.gmra.mrb[14].mxu1 %vm684_vm2, %v1323_v27 }
 0xa8d   : > { %2543 = vmatprep.mubr.msk.f32.mxu1 %vm2773_vm1, %v2772_v12 }
 0xa8f   : > { %v1476_v29 = vpop.f32.mrb[6].mxu0 }
 0xa90   : > { %v1480_v30 = vmul.f32 0.35355338, %v1476_v29  ;;  %v2540_v31 = vpop.f32.mrb[7].mxu0  ;;  %v2398_v29 = vld [vmem:[%s3217_s14] ss:$0 sm:$0xff] }
 0xa92   : > { %v1481_v32 = vsel %vm684_vm2, %v1480_v30, -inf }
 0xa93   : > { %1482 = vmax.xlane.f32.xlu1 %v1481_v32 }
 0xaa4   : > { %1492 = vrot.lane.b32.xlu1 %v2972_v26, %s2784_s18  ;;  %v1568_v26 = vld [vmem:[%s3210_s7 + $0x18] sm:$0xff]  ;;  %s3242_s18 = sld [smem:[#allocation13_spill]] }
 0xaa5   : > { %2547 = vmatpush3.msra.mxu0 %v1568_v26 }
 0xaa6   : > { %2559 = vmatprep.subr.bf16.mxu0 %v2772_v12 }
 0xaaa   : > { %s3160_s27 = scalar_lea.hbm %s3242_s18, %s2430_s19 }
 0xb20   : > { %v1483_v33 = vpop.xlane.xlu1 %1482 }
 0xb21   : > { %v1484_v34 = vsub.f32 %v1480_v30, %v1483_v33 }
 0xb23   : > { %v1485_v35 = vmul.f32 1.442695, %v1484_v34 }
 0xb24   : > { %v1493_v36 = vpop.permute.xlu1 %1492 }
 0xb25   : > { %2698 = vpow2.f32 %v1485_v35  ;;  %2542 = vmatpush3.msra.mxu1 %v1493_v36 }
 0xb26   : > { %2551 = vmatprep.subr.bf16.mxu1 %v2772_v12 }
 0xb2f   : > { %v2699_v37 = vpop.eup %2698 }
 0xb30   : > { %v1487_v38 = vsel %vm684_vm2, %v2699_v37, 0.0 }
 0xb31   : > { %1488 = vadd.xlane.f32.xlu0 %v1487_v38 }
 0xb5f   : > { %v1397_v39 = vpop.f32.mrb[14].mxu1 }
 0xb60   : > { %v1401_v40 = vadd.f32 %v1397_v39, %v1158_v7  ;;  %v2535_v41 = vpop.f32.mrb[15].mxu1  ;;  %v2675_v7 = vld [vmem:[%s3216_s13 + $0x8] sm:$0xff]  }
 0xbbe   : > { %v1489_v42 = vpop.xlane.xlu0 %1488 }
 0xbbf   : > { %2700 = vrcp.f32 %v1489_v42  ;;  %v2678_v42 = vld [vmem:[%s3220_s17 + $0x10] sm:$0xff]  }
 0xbc9   : > { %v2701_v43 = vpop.eup %2700 }
 0xbca   : > { %v1491_v44 = vmul.f32 %v2701_v43, %v2699_v37 }
 0xbcc   : > { %2544 = vmatmul.mubr.msk.f32.vlgmr.msra.gmra.mrb[16].mxu1 %vm684_vm2, %v1491_v44 }
 0xbcd   : > { %2555 = vmatprep.mubr.msk.bf16.mxu1 %vm2773_vm1, %v2772_v12  ;;  %2552 = vmatpush3.bf16.msra.mxu1 %v2672_v59  ;;  %v2679_v59 = vld [vmem:[%s3220_s17 + $0x18] sm:$0xff]  }
 0xbce   : > { %2553 = vmatprep.subr.bf16.mxu1 %v2772_v12 }
 0xbd1   : > { %2554 = vmatpush3.bf16.msra.mxu1 %v2673_v60 }
 0xbd2   : > { %2571 = vmatprep.subr.mxu1 %v2772_v12 }
 0xc9f   : > { %v1564_v45 = vpop.f32.mrb[16].mxu1 }
 0xca0   : > { %v2545_v46 = vpop.f32.mrb[17].mxu1  ;;  %2549 = vmatmul.mubr.msk.f32.vlgmr.msra.gmra.mrb[8].mxu0 %vm684_vm2, %v1564_v45  ;;  %v1871_v45 = vlaneseq }
 0xca1   : > { %2567 = vmatprep.mubr.msk.bf16.mxu0 %vm2773_vm1, %v2772_v12  ;;  %2560 = vmatpush3.bf16.msra.mxu0 %v2674_v6  ;;  %v2683_v6 = vld [vmem:[%s3220_s17 + $0x28] sm:$0xff]  }
 0xca2   : > { %2561 = vmatprep.subr.bf16.mxu0 %v2772_v12  ;;  %v1872_v46 = vshrl.u32 %v1871_v45, 7 }
 0xca5   : > { %2562 = vmatpush3.bf16.msra.mxu0 %v2675_v7 }
 0xca6   : > { %2563 = vmatprep.subr.bf16.mxu0 %v2772_v12 }
 0xca9   : > { %2564 = vmatpush3.bf16.msra.mxu0 %v2676_v8 }
 0xcaa   : > { %2565 = vmatprep.subr.bf16.mxu0 %v2772_v12 }
 0xcad   : > { %2566 = vmatpush3.bf16.msra.mxu0 %v2677_v9 }
 0xcae   : > { %2581 = vmatprep.subr.bf16.mxu0 %v2772_v12 }
 0xd73   : > { %v1638_v47 = vpop.f32.mrb[8].mxu0 }
 0xd74   : > { %v1642_v49 = vadd.f32 %v1638_v47, %v1401_v40  ;;  %v2550_v50 = vpop.f32.mrb[9].mxu0  ;;  %v1874_v47 = vand.u32 127, %v1871_v45 }
 0xd75   : > { %v2404_v50 = vld [vmem:[%s3218_s15] ss:$0 sm:$0xff] }
 0xd76   : > { %v1650_v51 = vadd.f32 %v2391_v48, %v1642_v49  ;;  %v1875_v48 = vadd.s32 4294967295, %v1872_v46  ;;  %vm1957_vm5 = vcmp.eq.s32.totalorder %v1874_v47, %v1872_v46 }
 0xd78   : > { %v1651_v52 = vadd.f32 %v1650_v51, %v2962_v22  ;;  %vm1876_vm4 = vcmp.eq.s32.totalorder %v1874_v47, %v1875_v48 }
 0xd7a   : > { %v1654_v53 = vsel %vm585_vm0, %v1651_v52, 0.0 }
 0xd7b   : > { %1655 = vadd.xlane.f32.xlu1 %v1654_v53 }
 0xe08   : > { %v1656_v54 = vpop.xlane.xlu1 %1655 }
 0xe09   : > { %v1657_v55 = vmul.f32 0.03125, %v1656_v54 }
 0xe0b   : > { %v1658_v56 = vsub.f32 %v1651_v52, %v1657_v55  ;;  %v2405_v52 = vld [vmem:[%s3219_s16] ss:$0 sm:$0xff]  ;;  %v2406_v55 = vsel %vm1876_vm4, 1.0, %v2772_v12 }
 0xe0d   : > { %v1659_v57 = vmul.f32 %v1658_v56, %v1658_v56 }
 0xe0f   : > { %v1660_v58 = vsel %vm585_vm0, %v1659_v57, 0.0  ;;  %v2408_v57 = vsel %vm1957_vm5, 1.0, %v2772_v12 }
 0xe10   : > { %1661 = vadd.xlane.f32.xlu0 %v1660_v58 }
 0xe9d   : > { %v1662_v22 = vpop.xlane.xlu0 %1661 }
 0xe9e   : > { %v1663_v61 = vmul.f32 0.03125, %v1662_v22 }
 0xea0   : > { %v1664_v62 = vadd.f32 1e-12, %v1663_v61 }
 0xea2   : > { %2702 = vrsqrt.f32 %v1664_v62  ;;  %v2680_v62 = vld [vmem:[%s3220_s17] sm:$0xff]  }
 0xeac   : > { %v2703_v63 = vpop.eup %2702 }
 0xead   : > { %v1666_v1 = vmul.f32 %v2703_v63, %v1658_v56  ;;  %v2149_v56 = vadd.s32 1, %v1872_v46 }
 0xeaf   : > { %v1673_v3 = vmul.f32 %v2392_v0, %v1666_v1  ;;  %vm2150_vm6 = vcmp.eq.s32.totalorder %v1874_v47, %v2149_v56  ;;  %v2681_v1 = vld [vmem:[%s3220_s17 + $0x8] sm:$0xff]  }
 0xeb0   : > { %v2420_v58 = vsel %vm2150_vm6, 1.0, %v2772_v12 }
 0xeb1   : > { %v1680_v4 = vadd.f32 %v2393_v2, %v1673_v3 }
 0xeb3   : > { %v1681_v5 = vpack.c.bf16 %v1680_v4, %v1680_v4 }
 0xeb5   : > { %2556 = vmatmul.mubr.msk.bf16.vlgmr.msra.gmra.mrb[20].mxu1 %vm585_vm0, %v1681_v5 }
 0xeb6   : > { %2573 = vmatprep.mubr.msk.f32.mxu1 %vm2773_vm1, %v2772_v12 }
 0xf88   : > { %v1742_v11 = vpop.f32.mrb[20].mxu1 }
 0xf89   : > { %v1743_v13 = vadd.f32 %v2394_v10, %v1742_v11  ;;  %v2557_v14 = vpop.f32.mrb[21].mxu1 }
 0xf8a   : > { %v1745_v15 = vpop.f32.mrb[22].mxu1 }
 0xf8b   : > { %v1749_v16 = vmul.f32 0.044715, %v1743_v13  ;;  %v2558_v17 = vpop.f32.mrb[23].mxu1  ;;  %v1748_v24 = vmul.f32 0.5, %v1743_v13 }
 0xf8d   : > { %v1750_v18 = vmul.f32 %v1749_v16, %v1743_v13 }
 0xf8f   : > { %v1751_v19 = vmul.f32 %v1750_v18, %v1743_v13 }
 0xf91   : > { %v1752_v20 = vadd.f32 %v1751_v19, %v1743_v13 }
 0xf93   : > { %v1753_v21 = vmul.f32 0.7978846, %v1752_v20 }
 0xf95   : > { %2704 = vtanh.f32 %v1753_v21 }
 0xf9f   : > { %v2705_v23 = vpop.eup %2704 }
 0xfa0   : > { %v1755_v25 = vadd.f32 1.0, %v2705_v23 }
 0xfa2   : > { %v1756_v27 = vmul.f32 %v1755_v25, %v1748_v24 }
 0xfa4   : > { %v1757_v28 = vpack.c.bf16 %v1756_v27, %v1756_v27 }
 0xfa6   : > { %2568 = vmatmul.mubr.msk.bf16.vlgmr.msra.gmra.mrb[12].mxu0 %vm1797_vm3, %v1757_v28 }
 0xfa7   : > { %2585 = vmatprep.mubr.msk.bf16.mxu0 %vm2773_vm1, %v2772_v12  ;;  %2582 = vmatpush3.bf16.msra.mxu0 %v2678_v42 }
 0xfa8   : > { %2583 = vmatprep.subr.bf16.mxu0 %v2772_v12 }
 0xfab   : > { %2584 = vmatpush3.bf16.msra.mxu0 %v2679_v59 }
 0xfac   : > { %2589 = vmatprep.subr.bf16.mxu0 %v2772_v12 }
0x1079   : > { %v1835_v30 = vpop.f32.mrb[12].mxu0 }
0x107a   : > { %v1836_v31 = vadd.f32 %v2398_v29, %v1835_v30  ;;  %v2569_v32 = vpop.f32.mrb[13].mxu0 }
0x107b   : > { %v1838_v33 = vpop.f32.mrb[14].mxu0 }
0x107c   : > { %v2570_v34 = vpop.f32.mrb[15].mxu0  ;;  %v1841_v35 = vadd.f32 %v1836_v31, %v1680_v4  ;;  %v2682_v4 = vld [vmem:[%s3220_s17 + $0x20] sm:$0xff]  }
0x107e   : > { %v1844_v36 = vsel %vm585_vm0, %v1841_v35, 0.0 }
0x107f   : > { %1845 = vadd.xlane.f32.xlu0 %v1844_v36 }
0x110c   : > { %v1846_v37 = vpop.xlane.xlu0 %1845 }
0x110d   : > { %v1847_v38 = vmul.f32 0.03125, %v1846_v37 }
0x110f   : > { %v1848_v39 = vsub.f32 %v1841_v35, %v1847_v38 }
0x1111   : > { %v1849_v40 = vmul.f32 %v1848_v39, %v1848_v39 }
0x1113   : > { %v1850_v41 = vsel %vm585_vm0, %v1849_v40, 0.0 }
0x1114   : > { %1851 = vadd.xlane.f32.xlu0 %v1850_v41 }
0x11a1   : > { %v1852_v43 = vpop.xlane.xlu0 %1851 }
0x11a2   : > { %v1853_v44 = vmul.f32 0.03125, %v1852_v43 }
0x11a4   : > { %v1854_v26 = vadd.f32 1e-12, %v1853_v44 }
0x11a6   : > { %2706 = vrsqrt.f32 %v1854_v26 }
0x11b0   : > { %v2707_v49 = vpop.eup %2706 }
0x11b1   : > { %v1856_v51 = vmul.f32 %v2707_v49, %v1848_v39 }
0x11b3   : > { %v1863_v53 = vmul.f32 %v2404_v50, %v1856_v51 }
0x11b5   : > { %v1870_v54 = vadd.f32 %v2405_v52, %v1863_v53 }
0x11b7   : > { %2572 = vmatpush3.msra.mxu1 %v1870_v54 }
0x11b8   : > { %2574 = vmatmul.mubr.msk.f32.vlgmr.msra.gmra.mrb[18].mxu1 %vm684_vm2, %v2406_v55  ;;  %2576 = vmatprep.subr.mxu1 %v2772_v12 }
0x11b9   : > { %2577 = vmatpush3.msra.mxu1 %v1870_v54  ;;  %2578 = vmatprep.mubr.msk.f32.mxu1 %vm2773_vm1, %v2772_v12 }
0x11ba   : > { %2597 = vmatprep.subr.mxu1 %v2772_v12 }
0x11bc   : > { %2579 = vmatmul.mubr.msk.f32.vlgmr.msra.gmra.mrb[24].mxu1 %vm684_vm2, %v2408_v57 }
0x11bd   : > { %2598 = vmatpush3.msra.mxu1 %v1870_v54  ;;  %2599 = vmatprep.mubr.msk.f32.mxu1 %vm2773_vm1, %v2772_v12 }
0x11c0   : > { %2600 = vmatmul.mubr.msk.f32.vlgmr.msra.gmra.mrb[26].mxu1 %vm684_vm2, %v2420_v58 }
0x128b   : > { %v1948_v60 = vpop.f32.mrb[18].mxu1 }
0x128c   : > { %v2575_v22 = vpop.f32.mrb[19].mxu1  ;;  %v1952_v5 = vpack.c.bf16 %v1948_v60, %v1948_v60 }
0x128f   : > { %v2029_v61 = vpop.f32.mrb[24].mxu1 }
0x1290   : > { %v2033_v63 = vpack.c.bf16 %v2029_v61, %v2029_v61  ;;  %v2580_v0 = vpop.f32.mrb[25].mxu1 }
0x1292   : > { %2586 = vmatmul.mubr.msk.bf16.vlgmr.msra.gmra.mrb[16].mxu0 %vm585_vm0, %v2033_v63 }
0x1293   : > { %2590 = vmatpush3.bf16.msra.mxu0 %v2680_v62  ;;  %2593 = vmatprep.mubr.msk.bf16.mxu0 %vm2773_vm1, %v2772_v12  ;;  %v2222_v2 = vpop.f32.mrb[26].mxu1 }
0x1294   : > { %2591 = vmatprep.subr.bf16.mxu0 %v2772_v12  ;;  %v2601_v3 = vpop.f32.mrb[27].mxu1  ;;  %v2226_v7 = vpack.c.bf16 %v2222_v2, %v2222_v2 }
0x1297   : > { %2592 = vmatpush3.bf16.msra.mxu0 %v2681_v1 }
0x1298   : > { %2602 = vmatprep.subr.bf16.mxu0 %v2772_v12 }
0x129e   : > { %2594 = vmatmul.mubr.msk.bf16.vlgmr.msra.gmra.mrb[16].mxu0 %vm585_vm0, %v1952_v5 }
0x129f   : > { %2603 = vmatpush3.bf16.msra.mxu0 %v2682_v4  ;;  %2606 = vmatprep.mubr.msk.bf16.mxu0 %vm2773_vm1, %v2772_v12 }
0x12a0   : > { %2604 = vmatprep.subr.bf16.mxu0 %v2772_v12 }
0x12a3   : > { %2605 = vmatpush3.bf16.msra.mxu0 %v2683_v6 }
0x12aa   : > { %2607 = vmatmul.mubr.msk.bf16.vlgmr.msra.gmra.mrb[16].mxu0 %vm585_vm0, %v2226_v7 }
0x137d   : > { %v2281_v12 = vpop.f32.mrb[16].mxu0 }
0x137e   : > { %2288 = vst.msk [vmem:[%s566_s20] sm:$0xff] %vm585_vm0, %v2281_v12  ;;  %v2608_v8 = vpop.f32.mrb[17].mxu0 }
0x137f   : > { %v2284_v9 = vpop.f32.mrb[18].mxu0 }
0x1380   : > { %2721 = shalt.err (!%p2718_p3)
}
0x1381   : > { %s2722_s25 = scalar_lea.hbm %s3160_s27, 128  ;;  %s2726_s22 = scalar_lea.hbm %s3242_s18, 256 }
0x1382   : > { %p2723_p4 = scmp.ne.s32.totalorder %s3160_s27, %s2722_s25  ;;  %p2727_p9 = scmp.lt.u32.totalorder %s3160_s27, %s3242_s18 }
0x1383   : > { %p2728_p10 = scmp.lt.u32.totalorder %s2726_s22, %s2722_s25  ;;  %p2730_p12 = scmp.lt.u32.totalorder %s2722_s25, %s3160_s27 }
0x1384   : > { %p2724_p7 = pnand %p2723_p4, %p2919_p5 }
0x1385   : > { %p2729_p11 = por %p2728_p10, %p2727_p9 }
0x1386   : > { %p2725_p8 = pneg %p2724_p7 }
0x1387   : > { %p2731_p13 = por %p2730_p12, %p2729_p11 }
0x1389   : > { %p2732_p0 = pnand %p2731_p13, %p2725_p8 }
0x138b   : > { %2735 = shalt.err (!%p2732_p0)
}
0x138c   : > { %2618 = dma.vmem_to_hbm [thread:$0]  (%p2919_p5), %s3162_s21, 128, %s3160_s27, %s2290_s1   ;;  %v2609_v10 = vpop.f32.mrb[19].mxu0 }
0x138d PF: > { %s3243_s23 = sld [smem:[#allocation5_spill]]  ;;  %p2624_p1 = scmp.ge.s32.totalorder %s2770_s30, 2 }
0x138f   : > { %p2621_p2 = pnand %p2624_p1, %p2923_p6 }
0x1393   : > { %s2315_s26 = sand.u32 1, %s3243_s23  }
0x1394   : > { %s2316_s19 = scalar_lea.sflag [#allocation3], %s2315_s26 }
0x1395   : > { %2753 = dma.done.wait (!%p2621_p2), %s2316_s19, 128  }
0x1396   : > { %2755 = vsyncadd (!%p2621_p2), %s2316_s19, 4294967168  ;;  %s3245_s30 = sld [smem:[#allocation7_spill]]  ;;  %s3246_s25 = sld [smem:[#allocation6_spill]] }
0x1397   : > { %s3247_s29 = sld [smem:[#allocation8_spill]]  ;;  %s3248_s27 = smov %s2762_s28 }
0x139c   : > { %p28_p3 = scmp.ge.s32.totalorder %s3245_s30, 4   ;;  %s3249_s28 = smov %s3246_s25 }
0x139e   :  { %30 = sbr.rel (!%p28_p3) target bundleno = 8 (0x8), region = 129 }
0x13a5   :  { %2321 = vsyncpa [#allocation3], 1 }
0x13a6   :  { %2323 = vsyncpa [#allocation3 + $0x1], 1 }

</bundles_post_ra>
